<compile_context>
chip_gen: v7x
topology: tpu7x:2x2x1
jax: 0.10.0
libtpu: 0.0.40
codegen_flags: <defaults>
</compile_context>

<pallas_src>
import jax
import jax.numpy as jnp
from jax import lax
from jax.experimental import pallas as pl
from jax.experimental.pallas import tpu as pltpu


def _make_sparsemax_kernel(n_chunks, ic):
    """Build a sparsemax kernel for a (tb, D) block, reducing the pairwise
    'others' axis in `n_chunks` chunks of width `ic` (n_chunks * ic == D)."""

    def kernel(x_ref, o_ref):
        x = x_ref[...].astype(jnp.float32)                      # (tb, D)
        mx = jnp.max(x, axis=-1, keepdims=True)                 # (tb, 1)
        z = x - mx                                              # shift-invariant
        zc = z[:, :, None]                                      # (tb, D, 1) candidates

        def chunk_stats(zo):
            # zo: (tb, 1, ic) slice of the shifted row (the "others").
            mask = zo >= zc                                     # (tb, D, ic) bool
            k = jnp.sum(jnp.where(mask, 1.0, 0.0), axis=-1)     # (tb, D)
            s = jnp.sum(jnp.where(mask, zo, 0.0), axis=-1)      # (tb, D)
            return k, s

        if n_chunks == 1:
            k, s = chunk_stats(z[:, None, :])
        else:
            def body(c, carry):
                k_acc, s_acc = carry
                start = pl.multiple_of(c * ic, ic)
                zo = x_ref[:, pl.ds(start, ic)].astype(jnp.float32) - mx
                kc, sc = chunk_stats(zo[:, None, :])
                return k_acc + kc, s_acc + sc

            k, s = lax.fori_loop(
                0, n_chunks, body, (jnp.zeros_like(z), jnp.zeros_like(z)))

        in_support = (1.0 + k * z) > s                          # (tb, D) bool
        supp = jnp.sum(jnp.where(in_support, 1.0, 0.0), axis=-1, keepdims=True)
        s_star = jnp.sum(jnp.where(in_support, z, 0.0), axis=-1, keepdims=True)
        tau = (s_star - 1.0) / supp                             # (tb, 1); supp >= 1 always
        o_ref[...] = jnp.maximum(z - tau, 0.0).astype(o_ref.dtype)

    return kernel


def _choose_tiles(B, D):
    """Pick (row tile tb, pairwise chunk ic) under a VMEM budget."""
    # Chunk width over the reduce ("others") axis.
    if D <= 256:
        ic = D
    elif D % 256 == 0:
        ic = 256
    elif D % 128 == 0:
        ic = 128
    else:
        ic = D  # TODO(synk): pad the reduce axis for D not a multiple of 128.

    pair_budget = 8 * 1024 * 1024    # bytes for the (tb, D, ic) intermediate
    block_budget = 2 * 1024 * 1024   # bytes for one (tb, D) f32 in/out block
    cap = max(8, min(pair_budget // (D * ic * 4), block_budget // (D * 4)))

    # Largest multiple-of-8 divisor of B not exceeding the cap; otherwise the
    # whole batch as one block (always a legal block shape).
    tb = 0
    for t in range(8, min(B, cap) + 1, 8):
        if B % t == 0:
            tb = t
    if tb == 0:
        tb = B

    # Prefer a grid of >= 2 steps so both v7x TensorCores get work.
    if tb == B and B >= 16 and B % 16 == 0:
        tb = B // 2
    return tb, ic


def sparsemax(x):
    """Sparsemax along the last dim of an array of shape (..., D)."""
    orig_shape = x.shape
    D = orig_shape[-1]
    x2 = x.reshape(-1, D)
    B = x2.shape[0]

    tb, ic = _choose_tiles(B, D)
    n_chunks = D // ic
    kernel = _make_sparsemax_kernel(n_chunks, ic)

    out = pl.pallas_call(
        kernel,
        out_shape=jax.ShapeDtypeStruct((B, D), x.dtype),
        grid_spec=pltpu.PrefetchScalarGridSpec(
            num_scalar_prefetch=0,
            grid=(B // tb,),
            in_specs=[pl.BlockSpec((tb, D), lambda i: (i, 0))],
            out_specs=pl.BlockSpec((tb, D), lambda i: (i, 0)),
        ),
        compiler_params=pltpu.CompilerParams(
            dimension_semantics=("parallel",),
            vmem_limit_bytes=32 * 1024 * 1024,
        ),
    )(x2)
    return out.reshape(orig_shape)


def sparsemax_ref(x):
    """Plain-JAX reference (sort/cumsum formulation, mirrors the torch code)."""
    z = x - jnp.max(x, axis=-1, keepdims=True)
    z_srt = -jnp.sort(-z, axis=-1)                      # descending sort
    z_cumsum = jnp.cumsum(z_srt, axis=-1) - 1.0
    d = z.shape[-1]
    rhos = jnp.arange(1, d + 1, dtype=z.dtype)
    support = rhos * z_srt > z_cumsum
    supp_size = jnp.sum(support, axis=-1, keepdims=True)
    tau = jnp.take_along_axis(z_cumsum, supp_size - 1, axis=-1)
    tau = tau / supp_size.astype(z.dtype)
    return jnp.maximum(z - tau, 0.0)


if __name__ == "__main__":
    # Sparsemax has no learnable parameters; only inputs are needed.
    key = jax.random.PRNGKey(0)
    cases = [
        (8, 32),     # TabNet-like (batch, features): single block, whole batch
        (256, 64),   # multi-row tiles, grid of 2 steps (v7x megacore friendly)
        (8, 384),    # exercises the chunked pairwise path (ic=128, 3 chunks)
    ]
    for idx, (B, D) in enumerate(cases):
        k = jax.random.fold_in(key, idx)
        x = jax.random.normal(k, (B, D), dtype=jnp.float32)

        out = jax.block_until_ready(sparsemax(x))
        ref = sparsemax_ref(x)

        assert out.shape == x.shape and out.dtype == x.dtype
        assert jnp.allclose(out, ref, atol=1e-5, rtol=1e-5), f"mismatch at {(B, D)}"
        # Each row of sparsemax output sums to 1.
        assert jnp.allclose(jnp.sum(out, axis=-1), 1.0, atol=1e-5)

    print("KERNEL_OK")
</pallas_src>

<mosaic_0001>
module attributes {stable_mosaic.version = 11 : i64} {
  func.func @kernel(%arg0: i32, %arg1: memref<8x32xf32, #tpu.memory_space<vmem>>, %arg2: memref<8x32xf32, #tpu.memory_space<vmem>>) attributes {dimension_semantics = [#tpu.dimension_semantics<parallel>], iteration_bounds = array<i64: 1>, scalar_prefetch = 0 : i64, scratch_operands = 0 : i64, tpu.core_type = #tpu.core_type<tc>, window_params = [{transform_indices = @transform_0, window_bounds = array<i64: 8, 32>}, {transform_indices = @transform_1, window_bounds = array<i64: 8, 32>}]} {
    %c0 = arith.constant 0 : index
    %c0_0 = arith.constant 0 : index
    %0 = vector.load %arg1[%c0, %c0_0] : memref<8x32xf32, #tpu.memory_space<vmem>>, vector<8x32xf32>
    %cst = arith.constant dense<0xFF800000> : vector<8xf32>
    %1 = vector.multi_reduction <maximumf>, %0, %cst [1] : vector<8x32xf32> to vector<8xf32>
    %2 = vector.shape_cast %1 : vector<8xf32> to vector<8x1xf32>
    %3 = vector.broadcast %2 : vector<8x1xf32> to vector<8x32xf32>
    %4 = arith.subf %0, %3 : vector<8x32xf32>
    %5 = vector.shape_cast %4 : vector<8x32xf32> to vector<8x32x1xf32>
    %6 = vector.shape_cast %4 : vector<8x32xf32> to vector<8x1x32xf32>
    %7 = vector.broadcast %6 : vector<8x1x32xf32> to vector<8x32x32xf32>
    %8 = vector.broadcast %5 : vector<8x32x1xf32> to vector<8x32x32xf32>
    %9 = arith.cmpf oge, %7, %8 : vector<8x32x32xf32>
    %cst_1 = arith.constant 1.000000e+00 : f32
    %cst_2 = arith.constant 0.000000e+00 : f32
    %10 = vector.broadcast %cst_1 : f32 to vector<8x32x32xf32>
    %11 = vector.broadcast %cst_2 : f32 to vector<8x32x32xf32>
    %12 = arith.select %9, %10, %11 : vector<8x32x32xi1>, vector<8x32x32xf32>
    %cst_3 = arith.constant dense<0.000000e+00> : vector<8x32xf32>
    %13 = vector.multi_reduction <add>, %12, %cst_3 [2] : vector<8x32x32xf32> to vector<8x32xf32>
    %cst_4 = arith.constant 0.000000e+00 : f32
    %14 = vector.shape_cast %6 : vector<8x1x32xf32> to vector<8x1x32xf32>
    %15 = vector.broadcast %14 : vector<8x1x32xf32> to vector<8x32x32xf32>
    %16 = vector.broadcast %cst_4 : f32 to vector<8x32x32xf32>
    %17 = arith.select %9, %15, %16 : vector<8x32x32xi1>, vector<8x32x32xf32>
    %cst_5 = arith.constant dense<0.000000e+00> : vector<8x32xf32>
    %18 = vector.multi_reduction <add>, %17, %cst_5 [2] : vector<8x32x32xf32> to vector<8x32xf32>
    %19 = arith.mulf %13, %4 : vector<8x32xf32>
    %cst_6 = arith.constant 1.000000e+00 : f32
    %20 = vector.broadcast %cst_6 : f32 to vector<8x32xf32>
    %21 = arith.addf %20, %19 : vector<8x32xf32>
    %22 = arith.cmpf ogt, %21, %18 : vector<8x32xf32>
    %cst_7 = arith.constant 1.000000e+00 : f32
    %cst_8 = arith.constant 0.000000e+00 : f32
    %23 = vector.broadcast %cst_7 : f32 to vector<8x32xf32>
    %24 = vector.broadcast %cst_8 : f32 to vector<8x32xf32>
    %25 = arith.select %22, %23, %24 : vector<8x32xi1>, vector<8x32xf32>
    %cst_9 = arith.constant dense<0.000000e+00> : vector<8xf32>
    %26 = vector.multi_reduction <add>, %25, %cst_9 [1] : vector<8x32xf32> to vector<8xf32>
    %27 = vector.shape_cast %26 : vector<8xf32> to vector<8x1xf32>
    %cst_10 = arith.constant 0.000000e+00 : f32
    %28 = vector.broadcast %cst_10 : f32 to vector<8x32xf32>
    %29 = arith.select %22, %4, %28 : vector<8x32xi1>, vector<8x32xf32>
    %cst_11 = arith.constant dense<0.000000e+00> : vector<8xf32>
    %30 = vector.multi_reduction <add>, %29, %cst_11 [1] : vector<8x32xf32> to vector<8xf32>
    %31 = vector.shape_cast %30 : vector<8xf32> to vector<8x1xf32>
    %cst_12 = arith.constant 1.000000e+00 : f32
    %32 = vector.broadcast %cst_12 : f32 to vector<8x1xf32>
    %33 = arith.subf %31, %32 : vector<8x1xf32>
    %34 = arith.divf %33, %27 : vector<8x1xf32>
    %35 = vector.broadcast %34 : vector<8x1xf32> to vector<8x32xf32>
    %36 = arith.subf %4, %35 : vector<8x32xf32>
    %cst_13 = arith.constant 0.000000e+00 : f32
    %37 = vector.broadcast %cst_13 : f32 to vector<8x32xf32>
    %38 = arith.maximumf %36, %37 : vector<8x32xf32>
    %c0_14 = arith.constant 0 : index
    %c0_15 = arith.constant 0 : index
    %39 = vector.load %arg2[%c0_14, %c0_15] : memref<8x32xf32, #tpu.memory_space<vmem>>, vector<8x32xf32>
    tpu.vector_store %arg2[%c0_14, %c0_15], %38 {strides = array<i32>} : memref<8x32xf32, #tpu.memory_space<vmem>>, vector<8x32xf32>,
    return
  }
  func.func @transform_0(%arg0: i32) -> (i32, i32) {
    %c0_i32 = arith.constant 0 : i32
    %c0_i32_0 = arith.constant 0 : i32
    return %arg0, %c0_i32 : i32, i32
  }
  func.func @transform_1(%arg0: i32) -> (i32, i32) {
    %c0_i32 = arith.constant 0 : i32
    %c0_i32_0 = arith.constant 0 : i32
    return %arg0, %c0_i32 : i32, i32
  }
}

</mosaic_0001>

<bundles_post_ra>
// kernel: tpu_custom_call.1
= control target key start
LH: loop header
LB: loop body
LE: loop exit
PB: predicated region body
PF: predicated region fallthrough
CT: control target
= control target key end

     0   :  { %6 = vsyncpa [#allocation3], 0  ;;  %s2827_s0 = inlined_call_operand.hbm [shape: f32[8,32], index: 0, kind: input, shape index: {}]   ;;  %s2828_s1 = inlined_call_operand.hbm [shape: f32[8,32], index: 1, kind: output, shape index: {}]  }
   0x1   :  { %7 = vsyncpa [#allocation4], 0  ;;  %s1657_s6 = smov [#allocation2]   ;;  %s1609_s10 = scalar_lea.hbm %s2827_s0, 128 }
   0x2   :  { %s14_s7 = sshll.u32 %s1657_s6, 4  ;;  %p1610_p0 = scmp.ne.s32.totalorder %s2827_s0, %s1609_s10  ;;  %s15_s7 = int_to_ptr.vmem [resolvable:$true] %s14_s7 }
   0x3   :  { %p1613_p1 = scmp.lt.u32.totalorder %s1609_s10, %s2827_s0 }
   0x5   :  { %p1615_p2 = pnand %p1613_p1, %p1610_p0 }
   0x7   :  { %1618 = shalt.err (!%p1615_p2)
}
   0x8   :  { %s1619_s15 = scalar_lea.vmem %s15_s7, 128  ;;  %p1624_p4 = scmp.lt.s32.totalorder %s15_s7, %s15_s7 }
   0x9   :  { %p1620_p3 = scmp.ne.s32.totalorder %s15_s7, %s1619_s15  ;;  %p1625_p5 = scmp.lt.s32.totalorder %s1619_s15, %s1619_s15 }
   0xb   :  { %p1626_p6 = por %p1625_p5, %p1624_p4 }
   0xd   :  { %p1627_p7 = pnand %p1626_p6, %p1620_p3 }
   0xf   :  { %1630 = shalt.err (!%p1627_p7)
}
  0x10   :  { %17 = dma.hbm_to_vmem [thread:$0]  %s2827_s0, 128, %s15_s7, [#allocation3]  }
  0x11   :  { %1653 = dma.done.wait [#allocation3], 128  }
  0x12   :  { %1654 = vsyncadd [#allocation3], 4294967168  ;;  %vm2858_vm0 = vcmask 261120   ;;  %v21_v0 = vld [vmem:[#allocation2] sm:$0xff]  ;;  %v2829_v2 = vlaneseq  ;;  %v1658_v22 = vmov 1966171168  }
  0x13   :  { %v23_v1 = vsel %vm2858_vm0, %v21_v0, -inf  ;;  %v182_v23 = vunpack.c.l.s4 %v1658_v22  ;;  %v2844_v33 = vmov 0.0   ;;  %s1661_s0 = smov [#allocation5]  }
  0x14   :  { %24 = vmax.xlane.f32.xlu0 %v23_v1  ;;  %v1686_v3 = vshrl.u32 %v2829_v2, 7  ;;  %s1510_s18 = sshll.u32 %s1661_s0, 4  ;;  %s1511_s18 = int_to_ptr.vmem [resolvable:$true] %s1510_s18 }
  0x15   :  { %v183_v24 = vunpack.c.0.s8 %v182_v23  ;;  %s1631_s19 = scalar_lea.vmem %s1511_s18, 128  ;;  %p1636_p9 = scmp.lt.s32.totalorder %s1511_s18, %s1511_s18 }
  0x16   :  { %2873 = vst [vmem:[#allocation8_spill] sm:$0xff] %v1686_v3  ;;  %v1689_v4 = vsub.s32 0, %v1686_v3  ;;  %v67_v8 = vsub.s32 2, %v1686_v3  ;;  %v48_v10 = vsub.s32 1, %v1686_v3  ;;  %v86_v11 = vsub.s32 3, %v1686_v3  ;;  %p1632_p8 = scmp.ne.s32.totalorder %s1511_s18, %s1631_s19  ;;  %p1637_p10 = scmp.lt.s32.totalorder %s1631_s19, %s1631_s19 }
  0x17   :  { %v105_v14 = vsub.s32 4, %v1686_v3  ;;  %v124_v16 = vsub.s32 5, %v1686_v3  ;;  %v143_v18 = vsub.s32 6, %v1686_v3  ;;  %v162_v20 = vsub.s32 7, %v1686_v3 }
  0x18   :  { %v1741_v25 = vsub.s32 %v183_v24, %v1686_v3  ;;  %p1638_p11 = por %p1637_p10, %p1636_p9 }
  0x1a   :  { %p1639_p12 = pnand %p1638_p11, %p1632_p8 }
  0xa1   :  { %v25_v5 = vpop.xlane.xlu0 %24 }
  0xa2   :  { %v1691_v6 = vsub.f32 %v21_v0, %v25_v5 }
  0xa4   :  { %2874 = vst [vmem:[#allocation9_spill] sm:$0xff] %v1691_v6  ;;  %v30_v7 = vrot.slane %v1691_v6, %v1689_v4  ;;  %v68_v9 = vrot.slane %v1691_v6, %v67_v8  ;;  %v49_v12 = vrot.slane %v1691_v6, %v48_v10  ;;  %v1701_v13 = vrot.slane %v1691_v6, %v86_v11 }
  0xa5   :  { %v1707_v15 = vrot.slane %v1691_v6, %v105_v14  ;;  %v1713_v17 = vrot.slane %v1691_v6, %v124_v16  ;;  %v1719_v19 = vrot.slane %v1691_v6, %v143_v18  ;;  %v1727_v21 = vrot.slane %v1691_v6, %v162_v20 }
  0xa6   :  { %36 = vbcast.lane.b32.xlu1 %v30_v7, 264  ;;  %32 = vbcast.lane.b32.xlu0 %v30_v7, 256  ;;  %v187_v26 = vrot.slane %v1691_v6, %v1741_v25  ;;  %v180_v47 = vcombine.high %v1691_v6, %v1691_v6 }
  0xa8   :  { %v203_v27 = vrot.slane %v187_v26, %v1741_v25  ;;  %v195_v30 = vcombine.high %v187_v26, %v187_v26  ;;  %v194_v56 = vrot.slane %v180_v47, %v1741_v25 }
  0xaa   :  { %40 = vbcast.lane.b32.xlu1 %v30_v7, 272  ;;  %70 = vbcast.lane.b32.xlu0 %v68_v9, 256  ;;  %v232_v28 = vrot.slane %v203_v27, %v1689_v4  ;;  %v225_v29 = vcombine.high %v203_v27, %v203_v27  ;;  %v217_v39 = vrot.slane %v195_v30, %v1741_v25 }
  0xab   :  { %v210_v61 = vrot.slane %v194_v56, %v1741_v25 }
  0xac   :  { %v1756_v38 = vrot.slane %v225_v29, %v1689_v4  ;;  %v227_v46 = vcombine.high %v217_v39, %v217_v39  ;;  %v236_v53 = vrot.slane %v217_v39, %v1689_v4 }
  0xad   :  { %v1823_v8 = vrot.slane %v210_v61, %v1689_v4 }
  0xae   :  { %44 = vbcast.lane.b32.xlu1 %v30_v7, 280  ;;  %78 = vbcast.lane.b32.xlu0 %v68_v9, 272  ;;  %v1791_v55 = vrot.slane %v227_v46, %v1689_v4 }
  0xb2   :  { %51 = vbcast.lane.b32.xlu1 %v49_v12, 256  ;;  %89 = vbcast.lane.b32.xlu0 %v1701_v13, 256 }
  0xb6   :  { %55 = vbcast.lane.b32.xlu1 %v49_v12, 264  ;;  %97 = vbcast.lane.b32.xlu0 %v1701_v13, 272 }
  0xba   :  { %59 = vbcast.lane.b32.xlu1 %v49_v12, 272  ;;  %108 = vbcast.lane.b32.xlu0 %v1707_v15, 256 }
  0xbe   :  { %63 = vbcast.lane.b32.xlu1 %v49_v12, 280  ;;  %116 = vbcast.lane.b32.xlu0 %v1707_v15, 272 }
  0xc2   :  { %74 = vbcast.lane.b32.xlu1 %v68_v9, 264  ;;  %127 = vbcast.lane.b32.xlu0 %v1713_v17, 256 }
  0xc6   :  { %82 = vbcast.lane.b32.xlu1 %v68_v9, 280  ;;  %135 = vbcast.lane.b32.xlu0 %v1713_v17, 272 }
  0xca   :  { %93 = vbcast.lane.b32.xlu1 %v1701_v13, 264  ;;  %146 = vbcast.lane.b32.xlu0 %v1719_v19, 256 }
  0xce   :  { %101 = vbcast.lane.b32.xlu1 %v1701_v13, 280  ;;  %154 = vbcast.lane.b32.xlu0 %v1719_v19, 272 }
  0xd2   :  { %112 = vbcast.lane.b32.xlu1 %v1707_v15, 264  ;;  %165 = vbcast.lane.b32.xlu0 %v1727_v21, 256 }
  0xd6   :  { %120 = vbcast.lane.b32.xlu1 %v1707_v15, 280  ;;  %173 = vbcast.lane.b32.xlu0 %v1727_v21, 272 }
  0xda   :  { %131 = vbcast.lane.b32.xlu1 %v1713_v17, 264  ;;  %566 = vbcast.lane.b32.xlu0 %v30_v7, 264 }
  0xde   :  { %139 = vbcast.lane.b32.xlu1 %v1713_v17, 280  ;;  %581 = vbcast.lane.b32.xlu0 %v49_v12, 256 }
  0xe2   :  { %150 = vbcast.lane.b32.xlu1 %v1719_v19, 264  ;;  %589 = vbcast.lane.b32.xlu0 %v49_v12, 272 }
  0xe6   :  { %158 = vbcast.lane.b32.xlu1 %v1719_v19, 280  ;;  %600 = vbcast.lane.b32.xlu0 %v68_v9, 256 }
  0xea   :  { %169 = vbcast.lane.b32.xlu1 %v1727_v21, 264  ;;  %608 = vbcast.lane.b32.xlu0 %v68_v9, 272 }
  0xee   :  { %177 = vbcast.lane.b32.xlu1 %v1727_v21, 280  ;;  %619 = vbcast.lane.b32.xlu0 %v1701_v13, 256 }
  0xf2   :  { %562 = vbcast.lane.b32.xlu1 %v30_v7, 256 }
  0xf6   :  { %570 = vbcast.lane.b32.xlu1 %v30_v7, 272 }
  0xfa   :  { %574 = vbcast.lane.b32.xlu1 %v30_v7, 280 }
  0xfe   :  { %585 = vbcast.lane.b32.xlu1 %v49_v12, 264 }
 0x102   :  { %593 = vbcast.lane.b32.xlu1 %v49_v12, 280 }
 0x106   :  { %604 = vbcast.lane.b32.xlu1 %v68_v9, 264 }
 0x10a   :  { %612 = vbcast.lane.b32.xlu1 %v68_v9, 280  ;;  %v196_v9 = vcombine.high %v194_v56, %v194_v56 }
 0x10c   :  { %v1841_v18 = vrot.slane %v196_v9, %v1741_v25 }
 0x10e   :  { %623 = vbcast.lane.b32.xlu1 %v1701_v13, 264  ;;  %v1862_v29 = vrot.slane %v1841_v18, %v1689_v4 }
 0x118   :  { %v37_v31 = vpop.permute.xlu1 %36  ;;  %v33_v32 = vpop.permute.xlu0 %32 }
 0x119   :  { %vm270_vm1 = vcmp.ge.f32.partialorder %v232_v28, %v37_v31  ;;  %vm269_vm2 = vcmp.ge.f32.partialorder %v232_v28, %v33_v32 }
 0x11a   :  { %v301_v34 = vsel %vm269_vm2, 1.0, %v2844_v33  ;;  %v1750_v35 = vsel %vm270_vm1, %v232_v28, 0.0  ;;  %v1752_v36 = vsel %vm269_vm2, %v232_v28, 0.0  ;;  %v302_v12 = vsel %vm270_vm1, 1.0, %v2844_v33 }
 0x11b   :  { %v333_v37 = vsel %vm2858_vm0, %v301_v34, 0.0  ;;  %v336_v23 = vsel %vm2858_vm0, %v302_v12, 0.0 }
 0x11c   :  { %v41_v40 = vpop.permute.xlu1 %40  ;;  %334 = vadd.xlane.f32.xlu0 %v333_v37  ;;  %v1759_v41 = vpop.permute.xlu0 %70 }
 0x11d   :  { %vm271_vm3 = vcmp.ge.f32.partialorder %v232_v28, %v41_v40  ;;  %vm277_vm4 = vcmp.ge.f32.partialorder %v1756_v38, %v1759_v41 }
 0x11e   :  { %v303_v42 = vsel %vm271_vm3, 1.0, %v2844_v33  ;;  %v1764_v43 = vsel %vm271_vm3, %v232_v28, 0.0  ;;  %v1770_v44 = vsel %vm277_vm4, %v1756_v38, 0.0 }
 0x11f   :  { %v339_v45 = vsel %vm2858_vm0, %v303_v42, 0.0 }
 0x120   :  { %v45_v48 = vpop.permute.xlu1 %44  ;;  %340 = vadd.xlane.f32.xlu0 %v339_v45  ;;  %v1775_v49 = vpop.permute.xlu0 %78  ;;  %v226_v45 = vcombine.high %v210_v61, %v210_v61 }
 0x121   :  { %vm272_vm5 = vcmp.ge.f32.partialorder %v232_v28, %v45_v48  ;;  %vm279_vm6 = vcmp.ge.f32.partialorder %v1756_v38, %v1775_v49 }
 0x122   :  { %v304_v50 = vsel %vm272_vm5, 1.0, %v2844_v33  ;;  %v1780_v51 = vsel %vm272_vm5, %v232_v28, 0.0  ;;  %v1786_v52 = vsel %vm279_vm6, %v1756_v38, 0.0  ;;  %v1905_v61 = vrot.slane %v226_v45, %v1689_v4 }
 0x123   :  { %v342_v54 = vsel %vm2858_vm0, %v304_v50, 0.0  ;;  %v311_v9 = vsel %vm279_vm6, 1.0, %v2844_v33 }
 0x124   :  { %v52_v57 = vpop.permute.xlu1 %51  ;;  %343 = vadd.xlane.f32.xlu0 %v342_v54  ;;  %v1794_v58 = vpop.permute.xlu0 %89 }
 0x125   :  { %vm273_vm7 = vcmp.ge.f32.partialorder %v236_v53, %v52_v57  ;;  %vm281_vm8 = vcmp.ge.f32.partialorder %v1791_v55, %v1794_v58 }
 0x126   :  { %v1799_v59 = vsel %vm273_vm7, %v236_v53, 0.0  ;;  %v1805_v60 = vsel %vm281_vm8, %v1791_v55, 0.0  ;;  %v305_v26 = vsel %vm273_vm7, 1.0, %v2844_v33 }
 0x127   :  { %v345_v32 = vsel %vm2858_vm0, %v305_v26, 0.0 }
 0x128   :  { %v56_v62 = vpop.permute.xlu1 %55  ;;  %v1808_v63 = vpop.permute.xlu0 %97 }
 0x129   :  { %vm274_vm9 = vcmp.ge.f32.partialorder %v236_v53, %v56_v62  ;;  %vm283_vm10 = vcmp.ge.f32.partialorder %v1791_v55, %v1808_v63 }
 0x12a   :  { %v306_v0 = vsel %vm274_vm9, 1.0, %v2844_v33  ;;  %v1813_v1 = vsel %vm274_vm9, %v236_v53, 0.0  ;;  %v1819_v5 = vsel %vm283_vm10, %v1791_v55, 0.0 }
 0x12b   :  { %v348_v7 = vsel %vm2858_vm0, %v306_v0, 0.0 }
 0x12c   :  { %v60_v10 = vpop.permute.xlu1 %59  ;;  %349 = vadd.xlane.f32.xlu0 %v348_v7  ;;  %v1825_v11 = vpop.permute.xlu0 %108 }
 0x12d   :  { %vm275_vm11 = vcmp.ge.f32.partialorder %v236_v53, %v60_v10  ;;  %vm285_vm12 = vcmp.ge.f32.partialorder %v1823_v8, %v1825_v11 }
 0x12e   :  { %v1832_v14 = vsel %vm275_vm11, %v236_v53, 0.0  ;;  %v1838_v16 = vsel %vm285_vm12, %v1823_v8, 0.0  ;;  %v307_v37 = vsel %vm275_vm11, 1.0, %v2844_v33 }
 0x12f   :  { %v351_v48 = vsel %vm2858_vm0, %v307_v37, 0.0 }
 0x130   :  { %v64_v20 = vpop.permute.xlu1 %63  ;;  %v1843_v22 = vpop.permute.xlu0 %116 }
 0x131   :  { %vm276_vm13 = vcmp.ge.f32.partialorder %v236_v53, %v64_v20  ;;  %vm287_vm14 = vcmp.ge.f32.partialorder %v1823_v8, %v1843_v22 }
 0x132   :  { %337 = vadd.xlane.f32.xlu1 %v336_v23  ;;  %v308_v24 = vsel %vm276_vm13, 1.0, %v2844_v33  ;;  %v1851_v27 = vsel %vm276_vm13, %v236_v53, 0.0  ;;  %v1857_v25 = vsel %vm287_vm14, %v1823_v8, 0.0  ;;  %v309_v53 = vsel %vm277_vm4, 1.0, %v2844_v33 }
 0x133   :  { %v354_v28 = vsel %vm2858_vm0, %v308_v24, 0.0  ;;  %v357_v41 = vsel %vm2858_vm0, %v309_v53, 0.0  ;;  %v228_v23 = vcombine.high %v1841_v18, %v1841_v18 }
 0x134   :  { %v75_v30 = vpop.permute.xlu1 %74  ;;  %355 = vadd.xlane.f32.xlu0 %v354_v28  ;;  %v1864_v31 = vpop.permute.xlu0 %127  ;;  %v313_v28 = vsel %vm281_vm8, 1.0, %v2844_v33 }
 0x135   :  { %vm278_vm15 = vcmp.ge.f32.partialorder %v1756_v38, %v75_v30  ;;  %vm289_vm1 = vcmp.ge.f32.partialorder %v1862_v29, %v1864_v31  ;;  %v369_v58 = vsel %vm2858_vm0, %v313_v28, 0.0 }
 0x136   :  { %346 = vadd.xlane.f32.xlu1 %v345_v32  ;;  %v310_v34 = vsel %vm278_vm15, 1.0, %v2844_v33  ;;  %v1874_v39 = vsel %vm278_vm15, %v1756_v38, 0.0  ;;  %v1880_v40 = vsel %vm289_vm1, %v1862_v29, 0.0 }
 0x137   :  { %v360_v42 = vsel %vm2858_vm0, %v310_v34, 0.0  ;;  %v1952_v34 = vrot.slane %v228_v23, %v1689_v4  ;;  %v315_v4 = vsel %vm283_vm10, 1.0, %v2844_v33 }
 0x138   :  { %v83_v46 = vpop.permute.xlu1 %82  ;;  %361 = vadd.xlane.f32.xlu0 %v360_v42  ;;  %v1883_v47 = vpop.permute.xlu0 %135 }
 0x139   :  { %vm280_vm2 = vcmp.ge.f32.partialorder %v1756_v38, %v83_v46  ;;  %vm291_vm3 = vcmp.ge.f32.partialorder %v1862_v29, %v1883_v47 }
 0x13a   :  { %352 = vadd.xlane.f32.xlu1 %v351_v48  ;;  %v312_v50 = vsel %vm280_vm2, 1.0, %v2844_v33  ;;  %v1895_v54 = vsel %vm280_vm2, %v1756_v38, 0.0  ;;  %v1901_v56 = vsel %vm291_vm3, %v1862_v29, 0.0  ;;  %v363_v38 = vsel %vm2858_vm0, %v311_v9, 0.0 }
 0x13b   :  { %v366_v57 = vsel %vm2858_vm0, %v312_v50, 0.0  ;;  %v323_v31 = vsel %vm291_vm3, 1.0, %v2844_v33 }
 0x13c   :  { %v94_v62 = vpop.permute.xlu1 %93  ;;  %367 = vadd.xlane.f32.xlu0 %v366_v57  ;;  %v1907_v0 = vpop.permute.xlu0 %146 }
 0x13d   :  { %vm282_vm4 = vcmp.ge.f32.partialorder %v1791_v55, %v94_v62  ;;  %vm293_vm5 = vcmp.ge.f32.partialorder %v1905_v61, %v1907_v0  ;;  %v317_v62 = vsel %vm285_vm12, 1.0, %v2844_v33 }
 0x13e   :  { %358 = vadd.xlane.f32.xlu1 %v357_v41  ;;  %v314_v7 = vsel %vm282_vm4, 1.0, %v2844_v33  ;;  %v1919_v10 = vsel %vm282_vm4, %v1791_v55, 0.0  ;;  %v1925_v12 = vsel %vm293_vm5, %v1905_v61, 0.0  ;;  %v381_v23 = vsel %vm2858_vm0, %v317_v62, 0.0 }
 0x13f   :  { %v372_v20 = vsel %vm2858_vm0, %v314_v7, 0.0  ;;  %v399_v62 = vsel %vm2858_vm0, %v323_v31, 0.0  ;;  %v470_v31 = vsel %vm2858_vm0, %v1780_v51, 0.0  ;;  %v473_v51 = vsel %vm2858_vm0, %v1799_v59, 0.0 }
 0x140   :  { %v102_v24 = vpop.permute.xlu1 %101  ;;  %373 = vadd.xlane.f32.xlu0 %v372_v20  ;;  %v1930_v26 = vpop.permute.xlu0 %154  ;;  %v500_v59 = vsel %vm2858_vm0, %v1919_v10, 0.0  ;;  %v503_v10 = vsel %vm2858_vm0, %v1819_v5, 0.0  ;;  %v515_v5 = vsel %vm2858_vm0, %v1857_v25, 0.0  ;;  %v527_v25 = vsel %vm2858_vm0, %v1901_v56, 0.0 }
 0x141   :  { %vm284_vm6 = vcmp.ge.f32.partialorder %v1791_v55, %v102_v24  ;;  %vm295_vm7 = vcmp.ge.f32.partialorder %v1905_v61, %v1930_v26  ;;  %v319_v24 = vsel %vm287_vm14, 1.0, %v2844_v33 }
 0x142   :  { %364 = vadd.xlane.f32.xlu1 %v363_v38  ;;  %v316_v49 = vsel %vm284_vm6, 1.0, %v2844_v33  ;;  %v1942_v18 = vsel %vm284_vm6, %v1791_v55, 0.0  ;;  %v1948_v30 = vsel %vm295_vm7, %v1905_v61, 0.0  ;;  %v375_v55 = vsel %vm2858_vm0, %v315_v4, 0.0 }
 0x143   :  { %v378_v32 = vsel %vm2858_vm0, %v316_v49, 0.0  ;;  %v327_v0 = vsel %vm295_vm7, 1.0, %v2844_v33  ;;  %v539_v56 = vsel %vm2858_vm0, %v1948_v30, 0.0 }
 0x144   :  { %v113_v37 = vpop.permute.xlu1 %112  ;;  %379 = vadd.xlane.f32.xlu0 %v378_v32  ;;  %v1954_v42 = vpop.permute.xlu0 %165  ;;  %v387_v32 = vsel %vm2858_vm0, %v319_v24, 0.0 }
 0x145   :  { %vm286_vm8 = vcmp.ge.f32.partialorder %v1823_v8, %v113_v37  ;;  %vm297_vm9 = vcmp.ge.f32.partialorder %v1952_v34, %v1954_v42 }
 0x146   :  { %370 = vadd.xlane.f32.xlu1 %v369_v58  ;;  %v318_v45 = vsel %vm286_vm8, 1.0, %v2844_v33  ;;  %v1966_v46 = vsel %vm286_vm8, %v1823_v8, 0.0  ;;  %v1972_v48 = vsel %vm297_vm9, %v1952_v34, 0.0 }
 0x147   :  { %v384_v50 = vsel %vm2858_vm0, %v318_v45, 0.0 }
 0x148   :  { %v121_v53 = vpop.permute.xlu1 %120  ;;  %385 = vadd.xlane.f32.xlu0 %v384_v50  ;;  %v1975_v57 = vpop.permute.xlu0 %173 }
 0x149   :  { %vm288_vm11 = vcmp.ge.f32.partialorder %v1823_v8, %v121_v53  ;;  %vm299_vm10 = vcmp.ge.f32.partialorder %v1952_v34, %v1975_v57  ;;  %v1660_v57 = vmov 0  }
 0x14a   :  { %376 = vadd.xlane.f32.xlu1 %v375_v55  ;;  %v320_v63 = vsel %vm288_vm11, 1.0, %v2844_v33  ;;  %v1987_v41 = vsel %vm288_vm11, %v1823_v8, 0.0  ;;  %v1993_v7 = vsel %vm299_vm10, %v1952_v34, 0.0  ;;  %v321_v8 = vsel %vm289_vm1, 1.0, %v2844_v33  ;;  %1525 = vset.pattern.permute.xlu0 %v1660_v57 }
 0x14b   :  { %v390_v9 = vsel %vm2858_vm0, %v320_v63, 0.0  ;;  %v393_v4 = vsel %vm2858_vm0, %v321_v8, 0.0  ;;  %1531 = vset.pattern.permute.xlu1 %v1660_v57  ;;  %v551_v30 = vsel %vm2858_vm0, %v1993_v7, 0.0 }
 0x14c   :  { %v132_v20 = vpop.permute.xlu1 %131  ;;  %391 = vadd.xlane.f32.xlu0 %v390_v9 }
 0x14d   :  { %vm290_vm13 = vcmp.ge.f32.partialorder %v1862_v29, %v132_v20 }
 0x14e   :  { %382 = vadd.xlane.f32.xlu1 %v381_v23  ;;  %v322_v11 = vsel %vm290_vm13, 1.0, %v2844_v33  ;;  %v2004_v38 = vsel %vm290_vm13, %v1862_v29, 0.0 }
 0x14f   :  { %v396_v49 = vsel %vm2858_vm0, %v322_v11, 0.0 }
 0x150   :  { %v140_v28 = vpop.permute.xlu1 %139  ;;  %397 = vadd.xlane.f32.xlu0 %v396_v49 }
 0x151   :  { %vm292_vm12 = vcmp.ge.f32.partialorder %v1862_v29, %v140_v28 }
 0x152   :  { %388 = vadd.xlane.f32.xlu1 %v387_v32  ;;  %v324_v37 = vsel %vm292_vm12, 1.0, %v2844_v33  ;;  %v2015_v22 = vsel %vm292_vm12, %v1862_v29, 0.0  ;;  %v325_v29 = vsel %vm293_vm5, 1.0, %v2844_v33 }
 0x153   :  { %v402_v58 = vsel %vm2858_vm0, %v324_v37, 0.0  ;;  %v405_v11 = vsel %vm2858_vm0, %v325_v29, 0.0  ;;  %v411_v37 = vsel %vm2858_vm0, %v327_v0, 0.0 }
 0x154   :  { %v151_v45 = vpop.permute.xlu1 %150  ;;  %403 = vadd.xlane.f32.xlu0 %v402_v58 }
 0x155   :  { %vm294_vm14 = vcmp.ge.f32.partialorder %v1905_v61, %v151_v45 }
 0x156   :  { %394 = vadd.xlane.f32.xlu1 %v393_v4  ;;  %v326_v50 = vsel %vm294_vm14, 1.0, %v2844_v33  ;;  %v2026_v53 = vsel %vm294_vm14, %v1905_v61, 0.0  ;;  %v331_v4 = vsel %vm299_vm10, 1.0, %v2844_v33 }
 0x157   :  { %v408_v55 = vsel %vm2858_vm0, %v326_v50, 0.0  ;;  %v464_v50 = vsel %vm2858_vm0, %v1750_v35, 0.0  ;;  %v423_v42 = vsel %vm2858_vm0, %v331_v4, 0.0  ;;  %v482_v35 = vsel %vm2858_vm0, %v1851_v27, 0.0 }
 0x158   :  { %v159_v63 = vpop.permute.xlu1 %158  ;;  %409 = vadd.xlane.f32.xlu0 %v408_v55  ;;  %v461_v55 = vsel %vm2858_vm0, %v1752_v36, 0.0  ;;  %v488_v36 = vsel %vm2858_vm0, %v1874_v39, 0.0  ;;  %v485_v27 = vsel %vm2858_vm0, %v1770_v44, 0.0  ;;  %v491_v39 = vsel %vm2858_vm0, %v1786_v52, 0.0 }
 0x159   :  { %vm296_vm15 = vcmp.ge.f32.partialorder %v1905_v61, %v159_v63  ;;  %v476_v63 = vsel %vm2858_vm0, %v1813_v1, 0.0  ;;  %v479_v1 = vsel %vm2858_vm0, %v1832_v14, 0.0  ;;  %v506_v14 = vsel %vm2858_vm0, %v1942_v18, 0.0 }
 0x15a   :  { %400 = vadd.xlane.f32.xlu1 %v399_v62  ;;  %v328_v9 = vsel %vm296_vm15, 1.0, %v2844_v33  ;;  %v2037_v47 = vsel %vm296_vm15, %v1905_v61, 0.0  ;;  %v329_v61 = vsel %vm297_vm9, 1.0, %v2844_v33  ;;  %v512_v44 = vsel %vm2858_vm0, %v1966_v46, 0.0  ;;  %v2102_v62 = vpop.permute.xlu0 %566 }
 0x15b   :  { %v414_v20 = vsel %vm2858_vm0, %v328_v9, 0.0  ;;  %v417_v45 = vsel %vm2858_vm0, %v329_v61, 0.0  ;;  %v518_v52 = vsel %vm2858_vm0, %v1987_v41, 0.0  ;;  %v509_v18 = vsel %vm2858_vm0, %v1838_v16, 0.0 }
 0x15c   :  { %v170_v23 = vpop.permute.xlu1 %169  ;;  %415 = vadd.xlane.f32.xlu0 %v414_v20  ;;  %v530_v41 = vsel %vm2858_vm0, %v2015_v22, 0.0  ;;  %v521_v16 = vsel %vm2858_vm0, %v1880_v40, 0.0  ;;  %v536_v20 = vsel %vm2858_vm0, %v2026_v53, 0.0  ;;  %v542_v22 = vsel %vm2858_vm0, %v2037_v47, 0.0 }
 0x15d   :  { %vm298_vm1 = vcmp.ge.f32.partialorder %v1952_v34, %v170_v23 }
 0x15e   :  { %406 = vadd.xlane.f32.xlu1 %v405_v11  ;;  %v330_v24 = vsel %vm298_vm1, 1.0, %v2844_v33  ;;  %v2048_v49 = vsel %vm298_vm1, %v1952_v34, 0.0  ;;  %v2110_v46 = vpop.permute.xlu0 %581  ;;  %v533_v11 = vsel %vm2858_vm0, %v1925_v12, 0.0  ;;  %v545_v12 = vsel %vm2858_vm0, %v1972_v48, 0.0 }
 0x15f   :  { %v420_v28 = vsel %vm2858_vm0, %v330_v24, 0.0  ;;  %v548_v53 = vsel %vm2858_vm0, %v2048_v49, 0.0 }
 0x160   :  { %v178_v32 = vpop.permute.xlu1 %177  ;;  %421 = vadd.xlane.f32.xlu0 %v420_v28 }
 0x161   :  { %vm300_vm2 = vcmp.ge.f32.partialorder %v1952_v34, %v178_v32 }
 0x162   :  { %412 = vadd.xlane.f32.xlu1 %v411_v37  ;;  %v332_v8 = vsel %vm300_vm2, 1.0, %v2844_v33  ;;  %v2059_v26 = vsel %vm300_vm2, %v1952_v34, 0.0  ;;  %v467_v34 = vsel %vm2858_vm0, %v1764_v43, 0.0  ;;  %v494_v43 = vsel %vm2858_vm0, %v1895_v54, 0.0  ;;  %v2120_v29 = vpop.permute.xlu0 %589 }
 0x163   :  { %v426_v58 = vsel %vm2858_vm0, %v332_v8, 0.0  ;;  %v497_v54 = vsel %vm2858_vm0, %v1805_v60, 0.0  ;;  %v524_v60 = vsel %vm2858_vm0, %v2004_v38, 0.0  ;;  %2875 = vst [vmem:[#allocation10_spill] sm:$0xff] %v2120_v29  ;;  %v554_v0 = vsel %vm2858_vm0, %v2059_v26, 0.0 }
 0x164   :  { %427 = vadd.xlane.f32.xlu0 %v426_v58  ;;  %v2112_v9 = vpop.permute.xlu1 %562 }
 0x166   :  { %418 = vadd.xlane.f32.xlu1 %v417_v45  ;;  %v2130_v23 = vpop.permute.xlu0 %600 }
 0x167   :  { %2877 = vst [vmem:[#allocation12_spill] sm:$0xff] %v2130_v23 }
 0x168   :  { %465 = vadd.xlane.f32.xlu0 %v464_v50  ;;  %v2122_v38 = vpop.permute.xlu1 %570 }
 0x169   :  { %2876 = vst [vmem:[#allocation11_spill] sm:$0xff] %v2122_v38 }
 0x16a   :  { %424 = vadd.xlane.f32.xlu1 %v423_v42  ;;  %v2140_v24 = vpop.permute.xlu0 %608 }
 0x16b   :  { %2879 = vst [vmem:[#allocation14_spill] sm:$0xff] %v2140_v24 }
 0x16c   :  { %471 = vadd.xlane.f32.xlu0 %v470_v31  ;;  %v2132_v40 = vpop.permute.xlu1 %574 }
 0x16d   :  { %2878 = vst [vmem:[#allocation13_spill] sm:$0xff] %v2132_v40 }
 0x16e   :  { %462 = vadd.xlane.f32.xlu1 %v461_v55  ;;  %v2148_v28 = vpop.permute.xlu0 %619 }
 0x16f   :  { %2880 = vst [vmem:[#allocation15_spill] sm:$0xff] %v2148_v28 }
 0x170   :  { %477 = vadd.xlane.f32.xlu0 %v476_v63  ;;  %v2142_v47 = vpop.permute.xlu1 %585 }
 0x172   :  { %468 = vadd.xlane.f32.xlu1 %v467_v34 }
 0x174   :  { %483 = vadd.xlane.f32.xlu0 %v482_v35  ;;  %v2150_v49 = vpop.permute.xlu1 %593 }
 0x176   :  { %474 = vadd.xlane.f32.xlu1 %v473_v51 }
 0x178   :  { %489 = vadd.xlane.f32.xlu0 %v488_v36  ;;  %v2154_v37 = vpop.permute.xlu1 %604 }
 0x179   :  { %2881 = vst [vmem:[#allocation16_spill] sm:$0xff] %v2154_v37 }
 0x17a   :  { %480 = vadd.xlane.f32.xlu1 %v479_v1 }
 0x17c   :  { %495 = vadd.xlane.f32.xlu0 %v494_v43  ;;  %v2156_v61 = vpop.permute.xlu1 %612 }
 0x17d   :  { %2882 = vst [vmem:[#allocation17_spill] sm:$0xff] %v2156_v61 }
 0x17e   :  { %486 = vadd.xlane.f32.xlu1 %v485_v27 }
 0x180   :  { %501 = vadd.xlane.f32.xlu0 %v500_v59  ;;  %v2159_v58 = vpop.permute.xlu1 %623 }
 0x181   :  { %2883 = vst [vmem:[#allocation18_spill] sm:$0xff] %v2159_v58 }
 0x182   :  { %492 = vadd.xlane.f32.xlu1 %v491_v39 }
 0x184   :  { %507 = vadd.xlane.f32.xlu0 %v506_v14 }
 0x186   :  { %498 = vadd.xlane.f32.xlu1 %v497_v54 }
 0x188   :  { %513 = vadd.xlane.f32.xlu0 %v512_v44 }
 0x18a   :  { %504 = vadd.xlane.f32.xlu1 %v503_v10 }
 0x18c   :  { %519 = vadd.xlane.f32.xlu0 %v518_v52 }
 0x18e   :  { %510 = vadd.xlane.f32.xlu1 %v509_v18 }
 0x190   :  { %525 = vadd.xlane.f32.xlu0 %v524_v60 }
 0x192   :  { %516 = vadd.xlane.f32.xlu1 %v515_v5 }
 0x194   :  { %531 = vadd.xlane.f32.xlu0 %v530_v41 }
 0x196   :  { %522 = vadd.xlane.f32.xlu1 %v521_v16 }
 0x198   :  { %537 = vadd.xlane.f32.xlu0 %v536_v20 }
 0x19a   :  { %528 = vadd.xlane.f32.xlu1 %v527_v25 }
 0x19c   :  { %543 = vadd.xlane.f32.xlu0 %v542_v22 }
 0x19e   :  { %534 = vadd.xlane.f32.xlu1 %v533_v11 }
 0x1a0   :  { %549 = vadd.xlane.f32.xlu0 %v548_v53 }
 0x1a2   :  { %540 = vadd.xlane.f32.xlu1 %v539_v56 }
 0x1a4   :  { %555 = vadd.xlane.f32.xlu0 %v554_v0 }
 0x1a6   :  { %546 = vadd.xlane.f32.xlu1 %v545_v12 }
 0x1a9   :  { %v335_v32 = vpop.xlane.xlu0 %334 }
 0x1aa   :  { %552 = vadd.xlane.f32.xlu1 %v551_v30  ;;  %v741_v60 = vmul.f32 %v2112_v9, %v335_v32 }
 0x1ac   :  { %v2239_v25 = vadd.f32 1.0, %v741_v60 }
 0x1ad   :  { %v341_v8 = vpop.xlane.xlu0 %340 }
 0x1ae   :  { %v743_v22 = vmul.f32 %v2122_v38, %v341_v8 }
 0x1b0   :  { %v2261_v32 = vadd.f32 1.0, %v743_v22 }
 0x1b1   :  { %v344_v26 = vpop.xlane.xlu0 %343 }
 0x1b2   :  { %v744_v41 = vmul.f32 %v2132_v40, %v344_v26  ;;  %2887 = vst [vmem:[#allocation22_spill] sm:$0xff] %v2261_v32 }
 0x1b4   :  { %v2246_v53 = vadd.f32 1.0, %v744_v41 }
 0x1b6   :  { %2885 = vst [vmem:[#allocation20_spill] sm:$0xff] %v2246_v53 }
 0x1b9   :  { %v350_v48 = vpop.xlane.xlu0 %349 }
 0x1ba   :  { %627 = vbcast.lane.b32.xlu0 %v1701_v13, 272  ;;  %v746_v56 = vmul.f32 %v2142_v47, %v350_v48 }
 0x1bb   :  { %631 = vbcast.lane.b32.xlu1 %v1701_v13, 280 }
 0x1be   :  { %638 = vbcast.lane.b32.xlu0 %v1707_v15, 256 }
 0x1bf   :  { %v338_v45 = vpop.xlane.xlu1 %337  ;;  %642 = vbcast.lane.b32.xlu1 %v1707_v15, 264 }
 0x1c0   :  { %v742_v52 = vmul.f32 %v2102_v62, %v338_v45  ;;  %v2268_v45 = vadd.f32 1.0, %v746_v56 }
 0x1c1   :  { %v2164_v7 = vpop.xlane.xlu0 %355 }
 0x1c2   :  { %646 = vbcast.lane.b32.xlu0 %v1707_v15, 272  ;;  %v2235_v16 = vadd.f32 1.0, %v742_v52  ;;  %v748_v52 = vmul.f32 %v2150_v49, %v2164_v7 }
 0x1c3   :  { %v347_v4 = vpop.xlane.xlu1 %346  ;;  %650 = vbcast.lane.b32.xlu1 %v1707_v15, 280 }
 0x1c4   :  { %v745_v8 = vmul.f32 %v2110_v46, %v347_v4 }
 0x1c5   :  { %v2168_v50 = vpop.xlane.xlu0 %361 }
 0x1c6   :  { %657 = vbcast.lane.b32.xlu0 %v1713_v17, 256  ;;  %v2284_v22 = vadd.f32 1.0, %v745_v8 }
 0x1c7   :  { %v2171_v42 = vpop.xlane.xlu1 %352  ;;  %661 = vbcast.lane.b32.xlu1 %v1713_v17, 264 }
 0x1c8   :  { %v747_v7 = vmul.f32 %v2120_v29, %v2171_v42 }
 0x1c9   :  { %v2174_v13 = vpop.xlane.xlu0 %367 }
 0x1ca   :  { %665 = vbcast.lane.b32.xlu0 %v1713_v17, 272  ;;  %v752_v6 = vmul.f32 %v2156_v61, %v2174_v13 }
 0x1cb   :  { %v2177_v31 = vpop.xlane.xlu1 %358  ;;  %669 = vbcast.lane.b32.xlu1 %v1713_v17, 280 }
 0x1cc   :  { %v2340_v3 = vadd.f32 1.0, %v752_v6 }
 0x1cd   :  { %v2180_v55 = vpop.xlane.xlu0 %373 }
 0x1ce   :  { %676 = vbcast.lane.b32.xlu0 %v1719_v19, 256  ;;  %2896 = vst [vmem:[#allocation31_spill] sm:$0xff] %v2340_v3  ;;  %v754_v61 = vmul.f32 %v2159_v58, %v2180_v55 }
 0x1cf   :  { %v2183_v15 = vpop.xlane.xlu1 %364  ;;  %680 = vbcast.lane.b32.xlu1 %v1719_v19, 264 }
 0x1d0   :  { %v751_v13 = vmul.f32 %v2140_v24, %v2183_v15  ;;  %v2364_v58 = vadd.f32 1.0, %v754_v61 }
 0x1d1   :  { %v2186_v63 = vpop.xlane.xlu0 %379 }
 0x1d2   :  { %684 = vbcast.lane.b32.xlu0 %v1719_v19, 272  ;;  %v2356_v6 = vadd.f32 1.0, %v751_v13  ;;  %2900 = vst [vmem:[#allocation35_spill] sm:$0xff] %v2364_v58 }
 0x1d3   :  { %v2189_v34 = vpop.xlane.xlu1 %370  ;;  %688 = vbcast.lane.b32.xlu1 %v1719_v19, 280 }
 0x1d4   :  { %2898 = vst [vmem:[#allocation33_spill] sm:$0xff] %v2356_v6  ;;  %v753_v55 = vmul.f32 %v2148_v28, %v2189_v34 }
 0x1d5   :  { %v2192_v35 = vpop.xlane.xlu0 %385 }
 0x1d6   :  { %695 = vbcast.lane.b32.xlu0 %v1727_v21, 256 }
 0x1d7   :  { %v2195_v17 = vpop.xlane.xlu1 %376  ;;  %699 = vbcast.lane.b32.xlu1 %v1727_v21, 264 }
 0x1d9   :  { %v2198_v51 = vpop.xlane.xlu0 %391 }
 0x1da   :  { %703 = vbcast.lane.b32.xlu0 %v1727_v21, 272 }
 0x1db   :  { %v2201_v36 = vpop.xlane.xlu1 %382  ;;  %707 = vbcast.lane.b32.xlu1 %v1727_v21, 280 }
 0x1dd   :  { %v2204_v1 = vpop.xlane.xlu0 %397 }
 0x1df   :  { %v2206_v43 = vpop.xlane.xlu1 %388 }
 0x1e1   :  { %v2208_v19 = vpop.xlane.xlu0 %403 }
 0x1e3   :  { %v2210_v27 = vpop.xlane.xlu1 %394 }
 0x1e5   :  { %v2212_v59 = vpop.xlane.xlu0 %409 }
 0x1e7   :  { %v2214_v57 = vpop.xlane.xlu1 %400 }
 0x1e9   :  { %v2216_v39 = vpop.xlane.xlu0 %415 }
 0x1eb   :  { %v2218_v14 = vpop.xlane.xlu1 %406 }
 0x1ed   :  { %v2220_v54 = vpop.xlane.xlu0 %421 }
 0x1ef   :  { %v2222_v44 = vpop.xlane.xlu1 %412 }
 0x1f1   :  { %v2224_v21 = vpop.xlane.xlu0 %427 }
 0x1f3   :  { %v2226_v10 = vpop.xlane.xlu1 %418 }
 0x1f5   :  { %v2229_v18 = vpop.xlane.xlu0 %465 }
 0x1f6   :  { %vm806_vm3 = vcmp.gt.f32.partialorder %v2235_v16, %v2229_v18 }
 0x1f7   :  { %v2232_v5 = vpop.xlane.xlu1 %424  ;;  %v838_v0 = vsel %vm806_vm3, 1.0, %v2844_v33 }
 0x1f9   :  { %v2237_v20 = vpop.xlane.xlu0 %471 }
 0x1fa   :  { %2884 = vst [vmem:[#allocation19_spill] sm:$0xff] %v2237_v20  ;;  %vm2868_vm5 = vcmp.gt.f32.partialorder %v2246_v53, %v2237_v20 }
 0x1fb   :  { %v2244_v11 = vpop.xlane.xlu1 %462  ;;  %v840_v4 = vsel %vm2868_vm5, 1.0, %v2844_v33 }
 0x1fc   :  { %vm805_vm4 = vcmp.gt.f32.partialorder %v2239_v25, %v2244_v11 }
 0x1fd   :  { %v837_v12 = vsel %vm805_vm4, 1.0, %v2844_v33  ;;  %v2259_v30 = vpop.xlane.xlu0 %477 }
 0x1fe   :  { %2886 = vst [vmem:[#allocation21_spill] sm:$0xff] %v2259_v30  ;;  %v1526_v26 = vpack.i.bf16 %v838_v0, %v837_v12  ;;  %vm810_vm7 = vcmp.gt.f32.partialorder %v2268_v45, %v2259_v30  ;;  %v2292_v12 = vadd.f32 1.0, %v748_v52  ;;  %v2308_v52 = vadd.f32 1.0, %v747_v7 }
 0x1ff   :  { %v2266_v48 = vpop.xlane.xlu1 %468  ;;  %v842_v42 = vsel %vm810_vm7, 1.0, %v2844_v33  ;;  %v1180_v18 = vsel %vm810_vm7, %v2142_v47, 0.0  ;;  %v2909_v47 = vld [vmem:[#allocation10_spill] sm:$0xff] }
 0x200   :  { %2888 = vst [vmem:[#allocation23_spill] sm:$0xff] %v2266_v48  ;;  %vm807_vm6 = vcmp.gt.f32.partialorder %v2261_v32, %v2266_v48  ;;  %1527 = vperm.xlu0 %1525, %v1526_v26   ;;  %v750_v26 = vmul.f32 %v2154_v37, %v2168_v50  ;;  %2890 = vst [vmem:[#allocation25_spill] sm:$0xff] %v2308_v52  ;;  %v749_v50 = vmul.f32 %v2130_v23, %v2177_v31 }
 0x201   :  { %v839_v60 = vsel %vm807_vm6, 1.0, %v2844_v33  ;;  %v2282_v41 = vpop.xlane.xlu0 %483 }
 0x202   :  { %v1532_v56 = vpack.i.bf16 %v840_v4, %v839_v60  ;;  %vm812_vm9 = vcmp.gt.f32.partialorder %v2292_v12, %v2282_v41  ;;  %v2316_v2 = vadd.f32 1.0, %v750_v26  ;;  %v2332_v26 = vadd.f32 1.0, %v749_v50  ;;  %v2914_v12 = vld [vmem:[#allocation12_spill] sm:$0xff] }
 0x203   :  { %v2290_v0 = vpop.xlane.xlu1 %474  ;;  %v844_v31 = vsel %vm812_vm9, 1.0, %v2844_v33  ;;  %v1176_v41 = vsel %vm806_vm3, %v2102_v62, 0.0 }
 0x204   :  { %vm809_vm8 = vcmp.gt.f32.partialorder %v2284_v22, %v2290_v0  ;;  %1533 = vperm.xlu1 %1531, %v1532_v56   ;;  %2892 = vst [vmem:[#allocation27_spill] sm:$0xff] %v2316_v2  ;;  %2894 = vst [vmem:[#allocation29_spill] sm:$0xff] %v2332_v26 }
 0x205   :  { %v841_v8 = vsel %vm809_vm8, 1.0, %v2844_v33  ;;  %v2306_v4 = vpop.xlane.xlu0 %489 }
 0x206   :  { %2889 = vst [vmem:[#allocation24_spill] sm:$0xff] %v2306_v4  ;;  %v1537_v60 = vpack.i.bf16 %v842_v42, %v841_v8  ;;  %vm2869_vm10 = vcmp.gt.f32.partialorder %v2316_v2, %v2306_v4 }
 0x207   :  { %v2314_v56 = vpop.xlane.xlu1 %480  ;;  %v846_v15 = vsel %vm2869_vm10, 1.0, %v2844_v33 }
 0x208   :  { %2891 = vst [vmem:[#allocation26_spill] sm:$0xff] %v2314_v56  ;;  %vm2872_vm11 = vcmp.gt.f32.partialorder %v2308_v52, %v2314_v56  ;;  %1538 = vperm.xlu1 %1531, %v1537_v60  }
 0x209   :  { %v843_v7 = vsel %vm2872_vm11, 1.0, %v2844_v33  ;;  %v2330_v42 = vpop.xlane.xlu0 %495 }
 0x20a   :  { %2893 = vst [vmem:[#allocation28_spill] sm:$0xff] %v2330_v42  ;;  %v1542_v8 = vpack.i.bf16 %v844_v31, %v843_v7  ;;  %vm2861_vm12 = vcmp.gt.f32.partialorder %v2340_v3, %v2330_v42 }
 0x20b   :  { %v2338_v60 = vpop.xlane.xlu1 %486  ;;  %v848_v13 = vsel %vm2861_vm12, 1.0, %v2844_v33 }
 0x20c   :  { %2895 = vst [vmem:[#allocation30_spill] sm:$0xff] %v2338_v60  ;;  %vm2870_vm13 = vcmp.gt.f32.partialorder %v2332_v26, %v2338_v60  ;;  %1543 = vperm.xlu0 %1525, %v1542_v8  }
 0x20d   :  { %v845_v50 = vsel %vm2870_vm13, 1.0, %v2844_v33  ;;  %v2354_v31 = vpop.xlane.xlu0 %501 }
 0x20e   :  { %2897 = vst [vmem:[#allocation32_spill] sm:$0xff] %v2354_v31  ;;  %v1547_v7 = vpack.i.bf16 %v846_v15, %v845_v50  ;;  %v2376_v15 = vadd.f32 1.0, %v753_v55  ;;  %vm2864_vm15 = vcmp.gt.f32.partialorder %v2364_v58, %v2354_v31 }
 0x20f   :  { %v2362_v8 = vpop.xlane.xlu1 %492  ;;  %v2911_v45 = vld [vmem:[#allocation26_spill] sm:$0xff] }
 0x210   :  { %2899 = vst [vmem:[#allocation34_spill] sm:$0xff] %v2362_v8  ;;  %vm2867_vm14 = vcmp.gt.f32.partialorder %v2356_v6, %v2362_v8  ;;  %1548 = vperm.xlu1 %1531, %v1547_v7   ;;  %2901 = vst [vmem:[#allocation36_spill] sm:$0xff] %v2376_v15  ;;  %v850_v7 = vsel %vm2864_vm15, 1.0, %v2844_v33 }
 0x211   :  { %v847_v34 = vsel %vm2867_vm14, 1.0, %v2844_v33  ;;  %v508_v28 = vpop.xlane.xlu0 %507 }
 0x212   :  { %v1552_v61 = vpack.i.bf16 %v848_v13, %v847_v34 }
 0x213   :  { %v2380_v50 = vpop.xlane.xlu1 %498 }
 0x214   :  { %2902 = vst [vmem:[#allocation37_spill] sm:$0xff] %v2380_v50  ;;  %vm2866_vm1 = vcmp.gt.f32.partialorder %v2376_v15, %v2380_v50  ;;  %1553 = vperm.xlu0 %1525, %v1552_v61  }
 0x215   :  { %v849_v55 = vsel %vm2866_vm1, 1.0, %v2844_v33  ;;  %v2392_v42 = vpop.xlane.xlu0 %513 }
 0x216   :  { %v1557_v3 = vpack.i.bf16 %v850_v7, %v849_v55 }
 0x217   :  { %v2394_v13 = vpop.xlane.xlu1 %504 }
 0x218   :  { %1558 = vperm.xlu1 %1531, %v1557_v3  }
 0x219   :  { %v520_v34 = vpop.xlane.xlu0 %519 }
 0x21b   :  { %v511_v8 = vpop.xlane.xlu1 %510 }
 0x21d   :  { %v2396_v6 = vpop.xlane.xlu0 %525 }
 0x21f   :  { %v2398_v61 = vpop.xlane.xlu1 %516 }
 0x221   :  { %v2400_v24 = vpop.xlane.xlu0 %531 }
 0x223   :  { %v2402_v31 = vpop.xlane.xlu1 %522 }
 0x225   :  { %v2404_v58 = vpop.xlane.xlu0 %537 }
 0x227   :  { %v2406_v50 = vpop.xlane.xlu1 %528 }
 0x229   :  { %v2408_v33 = vpop.xlane.xlu0 %543 }
 0x22b   :  { %v2410_v7 = vpop.xlane.xlu1 %534 }
 0x22d   :  { %v2412_v55 = vpop.xlane.xlu0 %549 }
 0x22f   :  { %v2414_v3 = vpop.xlane.xlu1 %540 }
 0x231   :  { %v2416_v15 = vpop.xlane.xlu0 %555 }
 0x233   :  { %v2418_v20 = vpop.xlane.xlu1 %546 }
 0x235   :  { %v2420_v53 = vpop.permute.xlu0 %627 }
 0x236   :  { %v755_v40 = vmul.f32 %v2420_v53, %v2195_v17 }
 0x237   :  { %v2424_v4 = vpop.xlane.xlu1 %552 }
 0x238   :  { %v2426_v37 = vadd.f32 1.0, %v755_v40 }
 0x239   :  { %v639_v2 = vpop.permute.xlu0 %638 }
 0x23a   :  { %v757_v60 = vmul.f32 %v639_v2, %v2201_v36  ;;  %vm819_vm2 = vcmp.gt.f32.partialorder %v2426_v37, %v2394_v13  ;;  %v2918_v13 = vld [vmem:[#allocation16_spill] sm:$0xff] }
 0x23b   :  { %v632_v26 = vpop.permute.xlu1 %631 }
 0x23c   :  { %v789_v23 = vadd.f32 1.0, %v757_v60  ;;  %v756_v56 = vmul.f32 %v632_v26, %v2186_v63  ;;  %v2904_v63 = vmov 0.0  }
 0x23d   :  { %v2430_v52 = vpop.permute.xlu0 %646  ;;  %v851_v60 = vsel %vm819_vm2, 1.0, %v2904_v63 }
 0x23e   :  { %vm821_vm0 = vcmp.gt.f32.partialorder %v789_v23, %v511_v8  ;;  %v788_v29 = vadd.f32 1.0, %v756_v56  ;;  %v759_v17 = vmul.f32 %v2430_v52, %v2206_v43 }
 0x23f   :  { %v2437_v48 = vsel %vm821_vm0, %v639_v2, 0.0  ;;  %v2439_v40 = vpop.permute.xlu1 %642 }
 0x240   :  { %2903 = vst [vmem:[#allocation38_spill] sm:$0xff] %v2437_v48  ;;  %vm820_vm12 = vcmp.gt.f32.partialorder %v788_v29, %v508_v28  ;;  %v758_v36 = vmul.f32 %v2439_v40, %v2192_v35  ;;  %v2450_v38 = vadd.f32 1.0, %v759_v17 }
 0x241   :  { %v852_v32 = vsel %vm820_vm12, 1.0, %v2904_v63  ;;  %v2448_v56 = vsel %vm820_vm12, %v632_v26, 0.0  ;;  %v658_v43 = vpop.permute.xlu0 %657  ;;  %v853_v26 = vsel %vm821_vm0, 1.0, %v2904_v63 }
 0x242   :  { %v1562_v2 = vpack.i.bf16 %v852_v32, %v851_v60  ;;  %v2452_v48 = vadd.f32 1.0, %v758_v36  ;;  %v761_v29 = vmul.f32 %v658_v43, %v2210_v27  ;;  %vm823_vm12 = vcmp.gt.f32.partialorder %v2450_v38, %v2398_v61  ;;  %v2919_v61 = vld [vmem:[#allocation27_spill] sm:$0xff] }
 0x243   :  { %v651_v28 = vpop.permute.xlu1 %650  ;;  %v1193_v37 = vsel %vm823_vm12, %v2430_v52, 0.0  ;;  %v2915_v52 = vld [vmem:[#allocation29_spill] sm:$0xff] }
 0x244   :  { %vm822_vm15 = vcmp.gt.f32.partialorder %v2452_v48, %v2392_v42  ;;  %v793_v35 = vadd.f32 1.0, %v761_v29  ;;  %v760_v30 = vmul.f32 %v651_v28, %v2198_v51  ;;  %1563 = vperm.xlu0 %1525, %v1562_v2   ;;  %v855_v2 = vsel %vm823_vm12, 1.0, %v2904_v63  ;;  %v2910_v48 = vld [vmem:[#allocation25_spill] sm:$0xff]  ;;  %v2916_v42 = vld [vmem:[#allocation30_spill] sm:$0xff] }
 0x245   :  { %v854_v32 = vsel %vm822_vm15, 1.0, %v2904_v63  ;;  %v2466_v27 = vpop.permute.xlu0 %665  ;;  %vm2912_vm3 = vcmp.gt.f32.partialorder %v2910_v48, %v2911_v45  ;;  %vm1157_vm12 = vcmask 1041409  }
 0x246   :  { %v1567_v17 = vpack.i.bf16 %v854_v32, %v853_v26  ;;  %vm825_vm1 = vcmp.gt.f32.partialorder %v793_v35, %v2402_v31  ;;  %v792_v36 = vadd.f32 1.0, %v760_v30  ;;  %v763_v51 = vmul.f32 %v2466_v27, %v2214_v57 }
 0x247   :  { %v2473_v23 = vsel %vm825_vm1, %v658_v43, 0.0  ;;  %v2475_v8 = vpop.permute.xlu1 %661  ;;  %v1181_v22 = vsel %vm2912_vm3, %v2909_v47, 0.0  ;;  %vm1165_vm3 = vcmask 1045509  }
 0x248   :  { %vm824_vm0 = vcmp.gt.f32.partialorder %v792_v36, %v520_v34  ;;  %v762_v60 = vmul.f32 %v2475_v8, %v2204_v1  ;;  %1568 = vperm.xlu1 %1531, %v1567_v17   ;;  %v2486_v57 = vadd.f32 1.0, %v763_v51 }
 0x249   :  { %v856_v30 = vsel %vm824_vm0, 1.0, %v2904_v63  ;;  %v2484_v29 = vsel %vm824_vm0, %v651_v28, 0.0  ;;  %v677_v43 = vpop.permute.xlu0 %676  ;;  %v857_v28 = vsel %vm825_vm1, 1.0, %v2904_v63 }
 0x24a   :  { %v1572_v26 = vpack.i.bf16 %v856_v30, %v855_v2  ;;  %v2488_v32 = vadd.f32 1.0, %v762_v60  ;;  %v765_v34 = vmul.f32 %v677_v43, %v2218_v14  ;;  %vm827_vm0 = vcmp.gt.f32.partialorder %v2486_v57, %v2406_v50  ;;  %v2924_v57 = vld [vmem:[#allocation19_spill] sm:$0xff] }
 0x24b   :  { %v670_v36 = vpop.permute.xlu1 %669 }
 0x24c   :  { %vm826_vm14 = vcmp.gt.f32.partialorder %v2488_v32, %v2396_v6  ;;  %v797_v1 = vadd.f32 1.0, %v765_v34  ;;  %v764_v17 = vmul.f32 %v670_v36, %v2208_v19  ;;  %1573 = vperm.xlu0 %1525, %v1572_v26   ;;  %v859_v26 = vsel %vm827_vm0, 1.0, %v2904_v63 }
 0x24d   :  { %v858_v14 = vsel %vm826_vm14, 1.0, %v2904_v63  ;;  %v2503_v51 = vpop.permute.xlu0 %684  ;;  %v1196_v16 = vsel %vm826_vm14, %v2475_v8, 0.0  ;;  %v2923_v8 = vld [vmem:[#allocation20_spill] sm:$0xff]  ;;  %vm1008_vm14 = vcmask 130112  }
 0x24e   :  { %v1577_v60 = vpack.i.bf16 %v858_v14, %v857_v28  ;;  %vm829_vm5 = vcmp.gt.f32.partialorder %v797_v1, %v2410_v7  ;;  %v796_v2 = vadd.f32 1.0, %v764_v17  ;;  %v767_v19 = vmul.f32 %v2503_v51, %v2222_v44 }
 0x24f   :  { %v2510_v31 = vsel %vm829_vm5, %v677_v43, 0.0  ;;  %v2512_v35 = vpop.permute.xlu1 %680 }
 0x250   :  { %vm828_vm1 = vcmp.gt.f32.partialorder %v796_v2, %v2400_v24  ;;  %v766_v30 = vmul.f32 %v2512_v35, %v2212_v59  ;;  %1578 = vperm.xlu1 %1531, %v1577_v60   ;;  %v2524_v17 = vadd.f32 1.0, %v767_v19 }
 0x251   :  { %v860_v34 = vsel %vm828_vm1, 1.0, %v2904_v63  ;;  %v2522_v44 = vsel %vm828_vm1, %v670_v36, 0.0  ;;  %v696_v43 = vpop.permute.xlu0 %695  ;;  %v861_v36 = vsel %vm829_vm5, 1.0, %v2904_v63 }
 0x252   :  { %v1582_v28 = vpack.i.bf16 %v860_v34, %v859_v26  ;;  %v2526_v14 = vadd.f32 1.0, %v766_v30  ;;  %v769_v24 = vmul.f32 %v696_v43, %v2226_v10  ;;  %vm831_vm1 = vcmp.gt.f32.partialorder %v2524_v17, %v2414_v3  ;;  %v2926_v3 = vld [vmem:[#allocation14_spill] sm:$0xff] }
 0x253   :  { %v689_v2 = vpop.permute.xlu1 %688  ;;  %v1201_v50 = vsel %vm831_vm1, %v2503_v51, 0.0  ;;  %v2927_v51 = vld [vmem:[#allocation33_spill] sm:$0xff] }
 0x254   :  { %vm2871_vm10 = vcmp.gt.f32.partialorder %v2526_v14, %v2404_v58  ;;  %v801_v59 = vadd.f32 1.0, %v769_v24  ;;  %v768_v60 = vmul.f32 %v689_v2, %v2216_v39  ;;  %1583 = vperm.xlu0 %1525, %v1582_v28   ;;  %v863_v24 = vsel %vm831_vm1, 1.0, %v2904_v63 }
 0x255   :  { %v862_v10 = vsel %vm2871_vm10, 1.0, %v2904_v63  ;;  %v704_v19 = vpop.permute.xlu0 %703  ;;  %vm1161_vm1 = vcmask 1043459  }
 0x256   :  { %v1587_v30 = vpack.i.bf16 %v862_v10, %v861_v36  ;;  %vm833_vm13 = vcmp.gt.f32.partialorder %v801_v59, %v2418_v20  ;;  %v800_v26 = vadd.f32 1.0, %v768_v60  ;;  %v771_v39 = vmul.f32 %v704_v19, %v2232_v5 }
 0x257   :  { %v2545_v34 = vsel %vm833_vm13, %v696_v43, 0.0  ;;  %v700_v7 = vpop.permute.xlu1 %699  ;;  %v1182_v20 = vsel %vm812_vm9, %v2150_v49, 0.0  ;;  %v1175_v59 = vsel %vm805_vm4, %v2112_v9, 0.0  ;;  %v1192_v49 = vsel %vm822_vm15, %v2439_v40, 0.0  ;;  %v2920_v40 = vld [vmem:[#allocation24_spill] sm:$0xff] }
 0x258   :  { %vm832_vm5 = vcmp.gt.f32.partialorder %v800_v26, %v2408_v33  ;;  %v803_v1 = vadd.f32 1.0, %v771_v39  ;;  %v770_v28 = vmul.f32 %v700_v7, %v2220_v54  ;;  %1588 = vperm.xlu1 %1531, %v1587_v30   ;;  %v865_v30 = vsel %vm833_vm13, 1.0, %v2904_v63 }
 0x259   :  { %v864_v60 = vsel %vm832_vm5, 1.0, %v2904_v63  ;;  %v2554_v36 = vsel %vm832_vm5, %v689_v2, 0.0  ;;  %v1179_v9 = vsel %vm809_vm8, %v2110_v46, 0.0  ;;  %v2906_v46 = vld [vmem:[#allocation11_spill] sm:$0xff]  ;;  %vm2913_vm4 = vcmp.gt.f32.partialorder %v2526_v14, %v2404_v58 }
 0x25a   :  { %v1592_v5 = vpack.i.bf16 %v864_v60, %v863_v24  ;;  %vm835_vm10 = vcmp.gt.f32.partialorder %v803_v1, %v2424_v4  ;;  %v802_v43 = vadd.f32 1.0, %v770_v28  ;;  %v1177_v38 = vsel %vm807_vm6, %v2906_v46, 0.0  ;;  %v2930_v14 = vld [vmem:[#allocation15_spill] sm:$0xff]  ;;  %v2931_v28 = vld [vmem:[#allocation36_spill] sm:$0xff]  ;;  %v2932_v24 = vld [vmem:[#allocation37_spill] sm:$0xff] }
 0x25b   :  { %v2557_v10 = vsel %vm835_vm10, %v704_v19, 0.0  ;;  %v708_v33 = vpop.permute.xlu1 %707  ;;  %v867_v4 = vsel %vm835_vm10, 1.0, %v2904_v63  ;;  %v1200_v0 = vsel %vm2913_vm4, %v2512_v35, 0.0  ;;  %vm2917_vm6 = vcmp.gt.f32.partialorder %v2915_v52, %v2916_v42  ;;  %v2928_v35 = vld [vmem:[#allocation34_spill] sm:$0xff]  ;;  %v2935_v60 = vld [vmem:[#allocation35_spill] sm:$0xff] }
 0x25c   :  { %vm834_vm11 = vcmp.gt.f32.partialorder %v802_v43, %v2412_v55  ;;  %v772_v54 = vmul.f32 %v708_v33, %v2224_v21  ;;  %1593 = vperm.xlu0 %1525, %v1592_v5   ;;  %v1183_v6 = vsel %vm2917_vm6, %v2914_v12, 0.0  ;;  %vm2921_vm7 = vcmp.gt.f32.partialorder %v2919_v61, %v2920_v40  ;;  %v2936_v5 = vld [vmem:[#allocation32_spill] sm:$0xff] }
 0x25d   :  { %v866_v2 = vsel %vm834_vm11, 1.0, %v2904_v63  ;;  %v1184_v58 = vsel %vm2921_vm7, %v2918_v13, 0.0  ;;  %vm2925_vm8 = vcmp.gt.f32.partialorder %v2923_v8, %v2924_v57  ;;  %vm2929_vm9 = vcmp.gt.f32.partialorder %v2927_v51, %v2928_v35 }
 0x25e   :  { %v1597_v26 = vpack.i.bf16 %v866_v2, %v865_v30  ;;  %v804_v39 = vadd.f32 1.0, %v772_v54  ;;  %v1185_v17 = vsel %vm2929_vm9, %v2926_v3, 0.0  ;;  %vm2933_vm10 = vcmp.gt.f32.partialorder %v2931_v28, %v2932_v24  ;;  %v2939_v54 = vld [vmem:[#allocation31_spill] sm:$0xff]  ;;  %v2940_v30 = vld [vmem:[#allocation28_spill] sm:$0xff] }
 0x25f   :  { %v1187_v55 = vsel %vm2933_vm10, %v2930_v14, 0.0  ;;  %vm2941_vm13 = vcmp.gt.f32.partialorder %v2939_v54, %v2940_v30  ;;  %vm1015_vm15 = vcmask 195712   ;;  %vm1167_vm4 = vcmask 1046534  }
 0x260   :  { %vm836_vm5 = vcmp.gt.f32.partialorder %v804_v39, %v2416_v15  ;;  %1598 = vperm.xlu1 %1531, %v1597_v26   ;;  %v1189_v15 = vsel %vm819_vm2, %v2420_v53, 0.0  ;;  %v1197_v53 = vsel %vm827_vm0, %v2466_v27, 0.0  ;;  %v2922_v27 = vld [vmem:[#allocation13_spill] sm:$0xff]  ;;  %v2942_v26 = vld [vmem:[#allocation38_spill] sm:$0xff]  ;;  %vm1022_vm2 = vcmask 261312  }
 0x261   :  { %v868_v19 = vsel %vm836_vm5, 1.0, %v2904_v63  ;;  %v1206_v1 = vsel %vm836_vm5, %v708_v33, 0.0  ;;  %v1204_v63 = vsel %vm834_vm11, %v700_v7, 0.0  ;;  %v1178_v32 = vsel %vm2925_vm8, %v2922_v27, 0.0  ;;  %v2934_v7 = vld [vmem:[#allocation18_spill] sm:$0xff]  ;;  %v2938_v33 = vld [vmem:[#allocation17_spill] sm:$0xff] }
 0x262   :  { %v1602_v21 = vpack.i.bf16 %v868_v19, %v867_v4  ;;  %vm2937_vm11 = vcmp.gt.f32.partialorder %v2935_v60, %v2936_v5  ;;  %v1186_v2 = vsel %vm2941_vm13, %v2938_v33, 0.0  ;;  %v2943_v4 = vlaneseq }
 0x263   :  { %v1188_v43 = vsel %vm2937_vm11, %v2934_v7, 0.0  ;;  %vm1159_vm0 = vcmask 1042434   ;;  %vm1163_vm5 = vcmask 1044484   ;;  %vm1169_vm6 = vcmask 1047559  }
 0x264   :  { %1261 = vperm.xlu1 %1531, %v1182_v20   ;;  %1603 = vperm.xlu0 %1525, %v1602_v21   ;;  %v998_v19 = vand.u32 127, %v2943_v4  ;;  %vm2945_vm7 = vcmask 261120  }
 0x265   :  { %vm2946_vm8 = vmmov %vm2945_vm7 }
 0x266   :  { %vm2948_vm9 = vmmov %vm2945_vm7 }
 0x268   :  { %1282 = vperm.xlu1 %1531, %v1189_v15   ;;  %1240 = vperm.xlu0 %1525, %v1175_v59   ;;  %v1003_v59 = vadd.s32 4294967288, %v998_v19 }
 0x26c   :  { %1291 = vperm.xlu1 %1531, %v1192_v49   ;;  %1243 = vperm.xlu0 %1525, %v1176_v41   ;;  %v2944_v41 = vld [vmem:[#allocation8_spill] sm:$0xff]  ;;  %v1017_v49 = vadd.s32 4294967272, %v998_v19 }
 0x270   :  { %1294 = vperm.xlu1 %1531, %v1193_v37   ;;  %1252 = vperm.xlu0 %1525, %v1179_v9  }
 0x274   :  { %1303 = vperm.xlu1 %1531, %v1196_v16   ;;  %1255 = vperm.xlu0 %1525, %v1180_v18   ;;  %v2676_v18 = vsub.s32 %v1017_v49, %v2944_v41 }
 0x278   :  { %1306 = vperm.xlu1 %1531, %v1197_v53   ;;  %1246 = vperm.xlu0 %1525, %v1177_v38  }
 0x27c   :  { %1315 = vperm.xlu1 %1531, %v1200_v0   ;;  %1258 = vperm.xlu0 %1525, %v1181_v22  }
 0x27f   :  { %v1528_v21 = vpop.permute.xlu0 %1527 }
 0x280   :  { %1318 = vperm.xlu1 %1531, %v1201_v50   ;;  %1264 = vperm.xlu0 %1525, %v1183_v6  }
 0x283   :  { %v1534_v39 = vpop.permute.xlu1 %1533 }
 0x284   :  { %1327 = vperm.xlu1 %1531, %v1204_v63   ;;  %1267 = vperm.xlu0 %1525, %v1184_v58   ;;  %v1536_v46 = vunpack.i.h.bf16 %v1534_v39 }
 0x286   :  { %v1021_v12 = vrot.slane %v1536_v46, %v2676_v18 }
 0x287   :  { %v1539_v20 = vpop.permute.xlu1 %1538 }
 0x288   :  { %1249 = vperm.xlu0 %1525, %v1178_v32   ;;  %v1541_v25 = vunpack.i.h.bf16 %v1539_v20  ;;  %v1540_v11 = vunpack.i.l.bf16 %v1539_v20 }
 0x28b   :  { %v1544_v15 = vpop.permute.xlu0 %1543 }
 0x28c   :  { %1270 = vperm.xlu0 %1525, %v1185_v17   ;;  %v1545_v48 = vunpack.i.l.bf16 %v1544_v15  ;;  %v1546_v58 = vunpack.i.h.bf16 %v1544_v15 }
 0x290   :  { %1276 = vperm.xlu0 %1525, %v1187_v55   ;;  %v1041_v55 = vrot.slane %v1546_v58, %v2676_v18 }
 0x293   :  { %v1554_v9 = vpop.permute.xlu0 %1553 }
 0x294   :  { %1279 = vperm.xlu0 %1525, %v1188_v43   ;;  %v1556_v3 = vunpack.i.h.bf16 %v1554_v9  ;;  %v1555_v51 = vunpack.i.l.bf16 %v1554_v9 }
 0x298   :  { %1273 = vperm.xlu0 %1525, %v1186_v2   ;;  %v1060_v2 = vrot.slane %v1556_v3, %v2676_v18 }
 0x29c   :  { %1288 = vperm.xlu0 %1525, %v2942_v26  }
 0x2a0   :  { %1285 = vperm.xlu0 %1525, %v2448_v56   ;;  %v1010_v56 = vadd.s32 4294967280, %v998_v19 }
 0x2a4   :  { %1300 = vperm.xlu0 %1525, %v2473_v23   ;;  %v1549_v23 = vpop.permute.xlu1 %1548 }
 0x2a5   :  { %v1551_v45 = vunpack.i.h.bf16 %v1549_v23  ;;  %v1550_v22 = vunpack.i.l.bf16 %v1549_v23 }
 0x2a8   :  { %1297 = vperm.xlu0 %1525, %v2484_v29   ;;  %v2666_v29 = vsub.s32 %v1003_v59, %v2944_v41  ;;  %v1559_v37 = vpop.permute.xlu1 %1558 }
 0x2a9   :  { %v1561_v50 = vunpack.i.h.bf16 %v1559_v37  ;;  %v1560_v13 = vunpack.i.l.bf16 %v1559_v37 }
 0x2aa   :  { %v1031_v52 = vrot.slane %v1541_v25, %v2666_v29  ;;  %v1050_v27 = vrot.slane %v1551_v45, %v2666_v29 }
 0x2ab   :  { %v1069_v35 = vrot.slane %v1561_v50, %v2666_v29 }
 0x2ac   :  { %1312 = vperm.xlu0 %1525, %v2510_v31   ;;  %v1530_v31 = vunpack.i.h.bf16 %v1528_v21 }
 0x2ae   :  { %v1007_v62 = vrot.slane %v1530_v31, %v2666_v29 }
 0x2b0   :  { %1309 = vperm.xlu0 %1525, %v2522_v44   ;;  %v2669_v44 = vsub.s32 %v998_v19, %v2944_v41 }
 0x2b2   :  { %v1027_v42 = vrot.slane %v1540_v11, %v2669_v44  ;;  %v1046_v8 = vrot.slane %v1550_v22, %v2669_v44  ;;  %v1065_v17 = vrot.slane %v1560_v13, %v2669_v44 }
 0x2b4   :  { %1324 = vperm.xlu0 %1525, %v2545_v34   ;;  %v1529_v34 = vunpack.i.l.bf16 %v1528_v21  ;;  %v1032_v32 = vsel %vm1008_vm14, %v1031_v52, %v1027_v42  ;;  %v1051_v43 = vsel %vm1008_vm14, %v1050_v27, %v1046_v8  ;;  %v1070_v21 = vsel %vm1008_vm14, %v1069_v35, %v1065_v17 }
 0x2b6   :  { %v1002_v16 = vrot.slane %v1529_v34, %v2669_v44 }
 0x2b8   :  { %1321 = vperm.xlu0 %1525, %v2554_v36   ;;  %v2672_v36 = vsub.s32 %v1010_v56, %v2944_v41  ;;  %v1009_v0 = vsel %vm1008_vm14, %v1007_v62, %v1002_v16 }
 0x2ba   :  { %v1036_v63 = vrot.slane %v1545_v48, %v2672_v36  ;;  %v1055_v19 = vrot.slane %v1555_v51, %v2672_v36 }
 0x2bc   :  { %1333 = vperm.xlu0 %1525, %v1206_v1   ;;  %v1535_v1 = vunpack.i.l.bf16 %v1534_v39  ;;  %v1037_v7 = vsel %vm1015_vm15, %v1036_v63, %v1032_v32  ;;  %v1056_v25 = vsel %vm1015_vm15, %v1055_v19, %v1051_v43 }
 0x2bd   :  { %v1061_v50 = vsel %vm1022_vm2, %v1060_v2, %v1056_v25 }
 0x2be   :  { %v1014_v38 = vrot.slane %v1535_v1, %v2672_v36 }
 0x2c0   :  { %v1016_v6 = vsel %vm1015_vm15, %v1014_v38, %v1009_v0 }
 0x2c1   :  { %v2691_v57 = vsel %vm1022_vm2, %v1021_v12, %v1016_v6  ;;  %v1042_v12 = vsel %vm1022_vm2, %v1041_v55, %v1037_v7 }
 0x2c2   :  { %v1158_v3 = vsel %vm1157_vm12, %v1042_v12, %v2691_v57 }
 0x2c3   :  { %v2680_v53 = vpop.permute.xlu0 %1563 }
 0x2c4   :  { %v1565_v14 = vunpack.i.l.bf16 %v2680_v53  ;;  %v1566_v20 = vunpack.i.h.bf16 %v2680_v53 }
 0x2c6   :  { %v1074_v59 = vrot.slane %v1565_v14, %v2672_v36  ;;  %v1079_v11 = vrot.slane %v1566_v20, %v2676_v18  ;;  %v1160_v14 = vsel %vm1159_vm0, %v1061_v50, %v1158_v3 }
 0x2c7   :  { %v1569_v47 = vpop.permute.xlu1 %1568 }
 0x2c8   :  { %v1571_v60 = vunpack.i.h.bf16 %v1569_v47  ;;  %v1570_v5 = vunpack.i.l.bf16 %v1569_v47  ;;  %v1075_v38 = vsel %vm1015_vm15, %v1074_v59, %v1070_v21 }
 0x2c9   :  { %v1080_v58 = vsel %vm1022_vm2, %v1079_v11, %v1075_v38 }
 0x2ca   :  { %v1088_v15 = vrot.slane %v1571_v60, %v2666_v29  ;;  %v1084_v23 = vrot.slane %v1570_v5, %v2669_v44 }
 0x2cb   :  { %v1574_v61 = vpop.permute.xlu0 %1573 }
 0x2cc   :  { %v1575_v33 = vunpack.i.l.bf16 %v1574_v61  ;;  %v1576_v41 = vunpack.i.h.bf16 %v1574_v61  ;;  %v1089_v48 = vsel %vm1008_vm14, %v1088_v15, %v1084_v23 }
 0x2ce   :  { %v1093_v49 = vrot.slane %v1575_v33, %v2672_v36  ;;  %v1098_v45 = vrot.slane %v1576_v41, %v2676_v18 }
 0x2cf   :  { %v1579_v40 = vpop.permute.xlu1 %1578 }
 0x2d0   :  { %v1581_v54 = vunpack.i.h.bf16 %v1579_v40  ;;  %v1580_v30 = vunpack.i.l.bf16 %v1579_v40  ;;  %v1094_v52 = vsel %vm1015_vm15, %v1093_v49, %v1089_v48 }
 0x2d1   :  { %v1099_v51 = vsel %vm1022_vm2, %v1098_v45, %v1094_v52 }
 0x2d2   :  { %v1107_v34 = vrot.slane %v1581_v54, %v2666_v29  ;;  %v1103_v1 = vrot.slane %v1580_v30, %v2669_v44 }
 0x2d3   :  { %v1584_v28 = vpop.permute.xlu0 %1583 }
 0x2d4   :  { %v1585_v26 = vunpack.i.l.bf16 %v1584_v28  ;;  %v1586_v9 = vunpack.i.h.bf16 %v1584_v28  ;;  %v1108_v42 = vsel %vm1008_vm14, %v1107_v34, %v1103_v1 }
 0x2d6   :  { %v1112_v37 = vrot.slane %v1585_v26, %v2672_v36  ;;  %v1117_v6 = vrot.slane %v1586_v9, %v2676_v18 }
 0x2d7   :  { %v1589_v24 = vpop.permute.xlu1 %1588 }
 0x2d8   :  { %v1591_v39 = vunpack.i.h.bf16 %v1589_v24  ;;  %v1590_v4 = vunpack.i.l.bf16 %v1589_v24  ;;  %v1113_v13 = vsel %vm1015_vm15, %v1112_v37, %v1108_v42  ;;  %v1162_v24 = vsel %vm1161_vm1, %v1080_v58, %v1160_v14 }
 0x2d9   :  { %v1118_v28 = vsel %vm1022_vm2, %v1117_v6, %v1113_v13  ;;  %v1164_v43 = vsel %vm1163_vm5, %v1099_v51, %v1162_v24 }
 0x2da   :  { %v1126_v62 = vrot.slane %v1591_v39, %v2666_v29  ;;  %v1122_v16 = vrot.slane %v1590_v4, %v2669_v44  ;;  %v1166_v54 = vsel %vm1165_vm3, %v1118_v28, %v1164_v43 }
 0x2db   :  { %v1594_v56 = vpop.permute.xlu0 %1593 }
 0x2dc   :  { %v1595_v31 = vunpack.i.l.bf16 %v1594_v56  ;;  %v1596_v46 = vunpack.i.h.bf16 %v1594_v56  ;;  %v1127_v61 = vsel %vm1008_vm14, %v1126_v62, %v1122_v16 }
 0x2de   :  { %v1131_v53 = vrot.slane %v1595_v31, %v2672_v36  ;;  %v1136_v40 = vrot.slane %v1596_v46, %v2676_v18 }
 0x2df   :  { %v1599_v47 = vpop.permute.xlu1 %1598 }
 0x2e0   :  { %v1601_v22 = vunpack.i.h.bf16 %v1599_v47  ;;  %v1600_v0 = vunpack.i.l.bf16 %v1599_v47  ;;  %v1132_v63 = vsel %vm1015_vm15, %v1131_v53, %v1127_v61 }
 0x2e1   :  { %v1137_v60 = vsel %vm1022_vm2, %v1136_v40, %v1132_v63 }
 0x2e2   :  { %v1145_v27 = vrot.slane %v1601_v22, %v2666_v29  ;;  %v1141_v8 = vrot.slane %v1600_v0, %v2669_v44  ;;  %v1168_v2 = vsel %vm1167_vm4, %v1137_v60, %v1166_v54 }
 0x2e3   :  { %v1604_v32 = vpop.permute.xlu0 %1603  ;;  %v1262_v37 = vpop.permute.xlu1 %1261 }
 0x2e4   :  { %v1606_v35 = vunpack.i.h.bf16 %v1604_v32  ;;  %v1605_v17 = vunpack.i.l.bf16 %v1604_v32  ;;  %v1146_v57 = vsel %vm1008_vm14, %v1145_v27, %v1141_v8  ;;  %v1371_v25 = vrot.slane %v1262_v37, %v2676_v18 }
 0x2e6   :  { %v1155_v55 = vrot.slane %v1606_v35, %v2676_v18  ;;  %v1150_v7 = vrot.slane %v1605_v17, %v2672_v36 }
 0x2e7   :  { %v1241_v5 = vpop.permute.xlu0 %1240  ;;  %v1283_v12 = vpop.permute.xlu1 %1282 }
 0x2e8   :  { %v1151_v33 = vsel %vm1015_vm15, %v1150_v7, %v1146_v57  ;;  %v1338_v19 = vrot.slane %v1241_v5, %v2669_v44  ;;  %v1404_v14 = vrot.slane %v1283_v12, %v2672_v36 }
 0x2e9   :  { %v1156_v30 = vsel %vm1022_vm2, %v1155_v55, %v1151_v33 }
 0x2ea   :  { %v1170_v26 = vsel %vm1169_vm6, %v1156_v30, %v1168_v2 }
 0x2eb   :  { %v1244_v39 = vpop.permute.xlu0 %1243  ;;  %v1172_v4 = vsel %vm2945_vm7, %v1170_v26, 0.0  ;;  %v1292_v42 = vpop.permute.xlu1 %1291 }
 0x2ec   :  { %v1342_v21 = vrot.slane %v1244_v39, %v2666_v29  ;;  %1173 = vadd.xlane.f32.xlu1 %v1172_v4  ;;  %v1418_v60 = vrot.slane %v1292_v42, %v2666_v29 }
 0x2ee   :  { %v1343_v20 = vsel %vm1008_vm14, %v1342_v21, %v1338_v19 }
 0x2ef   :  { %v1253_v59 = vpop.permute.xlu0 %1252  ;;  %v1295_v50 = vpop.permute.xlu1 %1294 }
 0x2f0   :  { %v1357_v15 = vrot.slane %v1253_v59, %v2669_v44  ;;  %v1423_v54 = vrot.slane %v1295_v50, %v2672_v36 }
 0x2f3   :  { %v1256_v56 = vpop.permute.xlu0 %1255  ;;  %v1304_v61 = vpop.permute.xlu1 %1303 }
 0x2f4   :  { %v1361_v23 = vrot.slane %v1256_v56, %v2666_v29  ;;  %v1437_v30 = vrot.slane %v1304_v61, %v2666_v29 }
 0x2f6   :  { %v1362_v41 = vsel %vm1008_vm14, %v1361_v23, %v1357_v15 }
 0x2f7   :  { %v1247_v31 = vpop.permute.xlu0 %1246  ;;  %v1307_v58 = vpop.permute.xlu1 %1306 }
 0x2f8   :  { %v1347_v62 = vrot.slane %v1247_v31, %v2672_v36 }
 0x2fa   :  { %v1348_v38 = vsel %vm1015_vm15, %v1347_v62, %v1343_v20  ;;  %v1442_v20 = vrot.slane %v1307_v58, %v2672_v36 }
 0x2fb   :  { %v1259_v49 = vpop.permute.xlu0 %1258  ;;  %v1316_v27 = vpop.permute.xlu1 %1315 }
 0x2fc   :  { %v1366_v1 = vrot.slane %v1259_v49, %v2672_v36  ;;  %v1456_v39 = vrot.slane %v1316_v27, %v2666_v29 }
 0x2fd   :  { %1330 = vperm.xlu1 %1531, %v2557_v10  }
 0x2fe   :  { %v1367_v16 = vsel %vm1015_vm15, %v1366_v1, %v1362_v41 }
 0x2ff   :  { %v1265_v34 = vpop.permute.xlu0 %1264  ;;  %v1372_v53 = vsel %vm1022_vm2, %v1371_v25, %v1367_v16  ;;  %v1319_v32 = vpop.permute.xlu1 %1318 }
 0x300   :  { %v1376_v57 = vrot.slane %v1265_v34, %v2669_v44  ;;  %v1461_v1 = vrot.slane %v1319_v32, %v2672_v36 }
 0x303   :  { %v1268_v9 = vpop.permute.xlu0 %1267  ;;  %v1328_v28 = vpop.permute.xlu1 %1327 }
 0x304   :  { %v1380_v35 = vrot.slane %v1268_v9, %v2666_v29 }
 0x306   :  { %v1381_v4 = vsel %vm1008_vm14, %v1380_v35, %v1376_v57 }
 0x307   :  { %v1250_v46 = vpop.permute.xlu0 %1249 }
 0x308   :  { %v1352_v11 = vrot.slane %v1250_v46, %v2676_v18 }
 0x30a   :  { %v1353_v10 = vsel %vm1022_vm2, %v1352_v11, %v1348_v38  ;;  %v1475_v11 = vrot.slane %v1328_v28, %v2666_v29 }
 0x30b   :  { %v1487_v47 = vsel %vm1157_vm12, %v1372_v53, %v1353_v10  ;;  %v1271_v48 = vpop.permute.xlu0 %1270 }
 0x30c   :  { %v1385_v24 = vrot.slane %v1271_v48, %v2672_v36 }
 0x30e   :  { %v1386_v59 = vsel %vm1015_vm15, %v1385_v24, %v1381_v4 }
 0x30f   :  { %v1277_v45 = vpop.permute.xlu0 %1276 }
 0x310   :  { %v1395_v55 = vrot.slane %v1277_v45, %v2669_v44 }
 0x313   :  { %v1280_v22 = vpop.permute.xlu0 %1279 }
 0x314   :  { %v1399_v51 = vrot.slane %v1280_v22, %v2666_v29 }
 0x316   :  { %v1400_v2 = vsel %vm1008_vm14, %v1399_v51, %v1395_v55 }
 0x317   :  { %v1274_v0 = vpop.permute.xlu0 %1273  ;;  %v1405_v31 = vsel %vm1015_vm15, %v1404_v14, %v1400_v2 }
 0x318   :  { %v1390_v5 = vrot.slane %v1274_v0, %v2676_v18 }
 0x31a   :  { %v1391_v41 = vsel %vm1022_vm2, %v1390_v5, %v1386_v59 }
 0x31b   :  { %v1289_v52 = vpop.permute.xlu0 %1288  ;;  %v1488_v38 = vsel %vm1159_vm0, %v1391_v41, %v1487_v47 }
 0x31c   :  { %v1414_v17 = vrot.slane %v1289_v52, %v2669_v44 }
 0x31e   :  { %v1419_v19 = vsel %vm1008_vm14, %v1418_v60, %v1414_v17 }
 0x31f   :  { %v1286_v6 = vpop.permute.xlu0 %1285  ;;  %v1424_v37 = vsel %vm1015_vm15, %v1423_v54, %v1419_v19 }
 0x320   :  { %v1409_v26 = vrot.slane %v1286_v6, %v2676_v18 }
 0x322   :  { %v1410_v9 = vsel %vm1022_vm2, %v1409_v26, %v1405_v31 }
 0x323   :  { %v1301_v13 = vpop.permute.xlu0 %1300  ;;  %v1489_v45 = vsel %vm1161_vm1, %v1410_v9, %v1488_v38 }
 0x324   :  { %v1433_v7 = vrot.slane %v1301_v13, %v2669_v44 }
 0x326   :  { %v1438_v56 = vsel %vm1008_vm14, %v1437_v30, %v1433_v7 }
 0x327   :  { %v1298_v40 = vpop.permute.xlu0 %1297  ;;  %v1443_v46 = vsel %vm1015_vm15, %v1442_v20, %v1438_v56 }
 0x328   :  { %v1428_v21 = vrot.slane %v1298_v40, %v2676_v18 }
 0x32a   :  { %v1429_v16 = vsel %vm1022_vm2, %v1428_v21, %v1424_v37 }
 0x32b   :  { %v1313_v63 = vpop.permute.xlu0 %1312  ;;  %v1490_v0 = vsel %vm1163_vm5, %v1429_v16, %v1489_v45 }
 0x32c   :  { %v1452_v43 = vrot.slane %v1313_v63, %v2669_v44 }
 0x32e   :  { %v1457_v49 = vsel %vm1008_vm14, %v1456_v39, %v1452_v43 }
 0x32f   :  { %v1310_v8 = vpop.permute.xlu0 %1309  ;;  %v1462_v10 = vsel %vm1015_vm15, %v1461_v1, %v1457_v49 }
 0x330   :  { %v1447_v15 = vrot.slane %v1310_v8, %v2676_v18 }
 0x332   :  { %v1448_v53 = vsel %vm1022_vm2, %v1447_v15, %v1443_v46 }
 0x333   :  { %v1325_v3 = vpop.permute.xlu0 %1324  ;;  %v1491_v47 = vsel %vm1165_vm3, %v1448_v53, %v1490_v0 }
 0x334   :  { %v1471_v62 = vrot.slane %v1325_v3, %v2669_v44 }
 0x336   :  { %v1476_v12 = vsel %vm1008_vm14, %v1475_v11, %v1471_v62 }
 0x337   :  { %v1322_v33 = vpop.permute.xlu0 %1321 }
 0x338   :  { %v1466_v34 = vrot.slane %v1322_v33, %v2676_v18 }
 0x33a   :  { %v1467_v22 = vsel %vm1022_vm2, %v1466_v34, %v1462_v10 }
 0x33b   :  { %v1334_v25 = vpop.permute.xlu0 %1333  ;;  %v1492_v6 = vsel %vm1167_vm4, %v1467_v22, %v1491_v47 }
 0x33c   :  { %v1485_v52 = vrot.slane %v1334_v25, %v2676_v18  ;;  %v2947_v18 = vld [vmem:[#allocation9_spill] sm:$0xff] }
 0x379   :  { %v1174_v23 = vpop.xlane.xlu1 %1173 }
 0x37a   :  { %1607 = vrcp.f32 %v1174_v23 }
 0x37d   :  { %v1331_v48 = vpop.permute.xlu1 %1330 }
 0x37e   :  { %v1480_v44 = vrot.slane %v1331_v48, %v2672_v36 }
 0x380   :  { %v1481_v29 = vsel %vm1015_vm15, %v1480_v44, %v1476_v12 }
 0x381   :  { %v1486_v42 = vsel %vm1022_vm2, %v1485_v52, %v1481_v29 }
 0x382   :  { %v1493_v50 = vsel %vm1169_vm6, %v1486_v42, %v1492_v6 }
 0x383   :  { %v1495_v13 = vsel %vm2946_vm8, %v1493_v50, 0.0 }
 0x384   :  { %1496 = vadd.xlane.f32.xlu1 %v1495_v13  ;;  %v1608_v40 = vpop.eup %1607 }
 0x411   :  { %v1497_v36 = vpop.xlane.xlu1 %1496 }
 0x412   :  { %v1519_v61 = vadd.f32 -1.0, %v1497_v36 }
 0x414   :  { %v1500_v58 = vmul.f32 %v1608_v40, %v1519_v61 }
 0x416   :  { %v1501_v63 = vsub.f32 %v2947_v18, %v1500_v58 }
 0x418   :  { %v1502_v27 = vmax.f32 %v1501_v63, 0.0 }
 0x41a   :  { %1503 = vst.msk [vmem:[#allocation5] sm:$0xff] %vm2948_vm9, %v1502_v27 }
 0x41b   :  { %1642 = shalt.err (!%p1639_p12)
}
 0x41c   :  { %s1643_s22 = scalar_lea.hbm %s2828_s1, 128 }
 0x41d   :  { %p1644_p13 = scmp.ne.s32.totalorder %s2828_s1, %s1643_s22  ;;  %p1647_p0 = scmp.lt.u32.totalorder %s1643_s22, %s2828_s1 }
 0x41f   :  { %p1649_p1 = pnand %p1647_p0, %p1644_p13 }
 0x421   :  { %1652 = shalt.err (!%p1649_p1)
}
 0x422   :  { %1513 = dma.vmem_to_hbm [thread:$0]  %s1511_s18, 128, %s2828_s1, [#allocation4]  }
 0x423   :  { %1655 = dma.done.wait [#allocation4], 128  }
 0x424   :  { %1656 = vsyncadd [#allocation4], 4294967168 }
 0x425   :  { %1517 = vsyncpa [#allocation3], 1 }
 0x426   :  { %1518 = vsyncpa [#allocation4], 1 }

</bundles_post_ra>
